<compile_context>
chip_gen: v7x
topology: tpu7x:2x2x1
jax: 0.10.0
libtpu: 0.0.40
codegen_flags: <defaults>
</compile_context>

<pallas_src>
import jax
import jax.numpy as jnp
from jax import lax
from jax.experimental import pallas as pl
from jax.experimental.pallas import tpu as pltpu

# ----------------------------- configuration ------------------------------
VOCAB = 32
EMB = 32
ENC_HID = 32
DEC_HID = 32
NUM_LAYERS = 1
Z_DIM = NUM_LAYERS * DEC_HID          # SequenceVAE requires num_layers*hid == z_dim
SEQ = 8
BATCH = 2
PAD, BOS, EOS, UNK = 0, 1, 2, 3       # src_dict special codes
VPAD = 128                            # lane-dense padded vocab width for the output store
NEG = -1.0e9                          # bias for padded logit lanes (exp underflows to 0)


# ------------------------------ kernel helpers -----------------------------
def _lstm_gates(gates, c_prev):
    """PyTorch LSTM cell update from pre-activation `gates` (order i, f, g, o).

    sigmoid/tanh are evaluated full-width over the (B, 4H) value (EUP) and the
    i/f/g/o pieces are taken as static lane slices of those results.
    """
    H = gates.shape[-1] // 4
    sg = jax.nn.sigmoid(gates)
    tg = jnp.tanh(gates)
    i = sg[:, 0 * H:1 * H]
    f = sg[:, 1 * H:2 * H]
    g = tg[:, 2 * H:3 * H]
    o = sg[:, 3 * H:4 * H]
    c_new = f * c_prev + i * g
    h_new = o * jnp.tanh(c_new)
    return h_new, c_new


# ------------------------------ fused kernel --------------------------------
def _sequence_vae_kernel(src_ref, trg_ref, emb_ref,
                         wf_ih_ref, wf_hh_ref, bf_ref,
                         wb_ih_ref, wb_hh_ref, bb_ref,
                         qwf_ref, qwb_ref, qb_ref,
                         dw_ih_ref, dw_hh_ref, db_ref,
                         ow_ref, ob_ref,
                         eps_ref, c0_ref,
                         logs_ref, mu_ref, logvar_ref,
                         dec_sc):
    SB = src_ref.shape[0]             # SEQ * BATCH (time-major flattening)
    B = eps_ref.shape[0]
    S = SB // B
    He = wf_hh_ref.shape[0]           # encoder hidden size

    # ---- embedding lookup as one-hot @ table matmuls (MXU, no gathers) -----
    lane = lax.broadcasted_iota(jnp.int32, (SB, VOCAB), 1)
    src_oh = jnp.where(src_ref[...] == lane, 1.0, 0.0).astype(jnp.float32)
    trg_oh = jnp.where(trg_ref[...] == lane, 1.0, 0.0).astype(jnp.float32)
    emb = emb_ref[...]
    x_src = jnp.dot(src_oh, emb, preferred_element_type=jnp.float32)   # (SB, E)
    x_trg = jnp.dot(trg_oh, emb, preferred_element_type=jnp.float32)   # (SB, E)

    # ---- hoisted input projections (bias pre-added, off the recurrent path) --
    gin_f = jnp.dot(x_src, wf_ih_ref[...],
                    preferred_element_type=jnp.float32) + bf_ref[...]   # (SB, 4H)
    gin_d = jnp.dot(x_trg, dw_ih_ref[...],
                    preferred_element_type=jnp.float32) + db_ref[...]   # (SB, 4H)

    # ---- encoder forward LSTM (fully unrolled; only h @ W_hh per step) -----
    wf_hh = wf_hh_ref[...]
    h = jnp.zeros((B, He), jnp.float32)
    c = jnp.zeros((B, He), jnp.float32)
    for t in range(S):
        gates = gin_f[t * B:(t + 1) * B, :] + jnp.dot(
            h, wf_hh, preferred_element_type=jnp.float32)
        h, c = _lstm_gates(gates, c)
    h_fwd = h                          # forward half of outs[-1]

    # ---- encoder backward half of outs[-1] ----------------------------------
    # NOTE: the base `Encoder` class is assumed to wrap a standard bidirectional
    # nn.LSTM whose per-step outputs are consumed via outs[-1]; the backward
    # direction's output at t = S-1 is its *first* step from a zero state, so a
    # single cell evaluation suffices (h = 0 -> no h @ W_hh term).
    gates_b = (jnp.dot(x_src[(S - 1) * B:S * B, :], wb_ih_ref[...],
                       preferred_element_type=jnp.float32) + bb_ref[...])
    h_bwd, _ = _lstm_gates(gates_b, jnp.zeros((B, He), jnp.float32))

    # ---- VAE head: fused [Q_mu | Q_logvar] linear + reparametrize -----------
    # h_last = [h_fwd, h_bwd]; computed as a split-row matmul (no concat needed)
    mulv = (jnp.dot(h_fwd, qwf_ref[...], preferred_element_type=jnp.float32)
            + jnp.dot(h_bwd, qwb_ref[...], preferred_element_type=jnp.float32)
            + qb_ref[...])                                   # (B, 2*Z_DIM)
    mu = mulv[:, :Z_DIM]
    logvar = mulv[:, Z_DIM:]
    z = mu + eps_ref[...] * jnp.exp(0.5 * logvar)
    mu_ref[...] = mu.astype(mu_ref.dtype)
    logvar_ref[...] = logvar.astype(logvar_ref.dtype)

    # ---- decoder LSTM: h0 = z (num_layers=1), c0 = xavier noise, unrolled ---
    dw_hh = dw_hh_ref[...]
    h = z
    c = c0_ref[...]
    for t in range(S):
        gates = gin_d[t * B:(t + 1) * B, :] + jnp.dot(
            h, dw_hh, preferred_element_type=jnp.float32)
        h, c = _lstm_gates(gates, c)
        dec_sc[t * B:(t + 1) * B, :] = h          # dropout p=0.0 -> identity

    # ---- output projection + log_softmax (lane-dense, vocab padded to 128) --
    logits = (jnp.dot(dec_sc[...], ow_ref[...],
                      preferred_element_type=jnp.float32) + ob_ref[...])  # (SB, VPAD)
    m = jnp.max(logits, axis=-1, keepdims=True)
    shifted = logits - m
    lse = jnp.log(jnp.sum(jnp.exp(shifted), axis=-1, keepdims=True))
    logs_ref[...] = (shifted - lse).astype(logs_ref.dtype)


# ------------------------------ forward wrapper -----------------------------
@jax.jit
def sequence_vae_forward(kp, src, trg, key):
    """Mirrors SequenceVAE.forward(src, trg) -> (dec_logs, mu, logvar).

    src, trg: (seq_len, batch) int32 token ids (time-major, PyTorch layout).
    Returns: dec_logs (seq_len*batch, vocab), mu (batch, z), logvar (batch, z).
    """
    S, B = src.shape
    k_eps, k_c0 = jax.random.split(key)

    # reparametrize noise (eps ~ N(0,1)) and decoder c_0 ~ xavier_uniform on a
    # fresh (num_layers, B, hid) tensor -- kept as two tiny fused XLA RNG ops.
    eps = jax.random.normal(k_eps, (B, Z_DIM), jnp.float32)
    fan_in, fan_out = B * DEC_HID, NUM_LAYERS * DEC_HID
    bound = (6.0 / (fan_in + fan_out)) ** 0.5
    c0 = jax.random.uniform(k_c0, (B, DEC_HID), minval=-bound, maxval=bound,
                            dtype=jnp.float32)

    # time-major flattening (t, b); word_dropout(p=0.0) on trg is the identity.
    src_ids = src.reshape(S * B, 1).astype(jnp.int32)
    trg_ids = trg.reshape(S * B, 1).astype(jnp.int32)

    operands = (src_ids, trg_ids, kp['emb'],
                kp['enc_wf_ih'], kp['enc_wf_hh'], kp['enc_bf'],
                kp['enc_wb_ih'], kp['enc_wb_hh'], kp['enc_bb'],
                kp['q_w_fwd'], kp['q_w_bwd'], kp['q_b'],
                kp['dec_w_ih'], kp['dec_w_hh'], kp['dec_b'],
                kp['out_w_pad'], kp['out_b_pad'],
                eps, c0)

    vmem = lambda: pl.BlockSpec(memory_space=pltpu.MemorySpace.VMEM)
    dec_logs_pad, mu, logvar = pl.pallas_call(
        _sequence_vae_kernel,
        out_shape=(jax.ShapeDtypeStruct((S * B, VPAD), jnp.float32),
                   jax.ShapeDtypeStruct((B, Z_DIM), jnp.float32),
                   jax.ShapeDtypeStruct((B, Z_DIM), jnp.float32)),
        in_specs=[vmem() for _ in operands],
        out_specs=(vmem(), vmem(), vmem()),
        scratch_shapes=[pltpu.VMEM((S * B, DEC_HID), jnp.float32)],
    )(*operands)

    dec_logs = dec_logs_pad[:, :VOCAB]     # strip lane padding
    return dec_logs, mu, logvar


# --------------------------- deterministic params ---------------------------
def init_params(key):
    ks = jax.random.split(key, 16)
    n = lambda k, shp, s=0.1: (s * jax.random.normal(k, shp)).astype(jnp.float32)

    emb = n(ks[0], (VOCAB, EMB))
    emb = emb.at[PAD].set(0.0)                               # padding_idx row

    return dict(
        emb=emb,
        # encoder bi-LSTM (forward / backward directions); each bias is the
        # combined (bias_ih + bias_hh) vector
        enc_wf_ih=n(ks[1], (EMB, 4 * ENC_HID)),
        enc_wf_hh=n(ks[2], (ENC_HID, 4 * ENC_HID)),
        enc_bf=n(ks[3], (1, 4 * ENC_HID)),
        enc_wb_ih=n(ks[4], (EMB, 4 * ENC_HID)),
        enc_wb_hh=n(ks[5], (ENC_HID, 4 * ENC_HID)),
        enc_bb=n(ks[6], (1, 4 * ENC_HID)),
        # VAE head
        q_mu_w=n(ks[7], (2 * ENC_HID, Z_DIM)),
        q_mu_b=n(ks[8], (1, Z_DIM)),
        q_lv_w=n(ks[9], (2 * ENC_HID, Z_DIM)),
        q_lv_b=n(ks[10], (1, Z_DIM)),
        # decoder StackedLSTM (num_layers=1)
        dec_w_ih=n(ks[11], (EMB, 4 * DEC_HID)),
        dec_w_hh=n(ks[12], (DEC_HID, 4 * DEC_HID)),
        dec_b=n(ks[13], (1, 4 * DEC_HID)),
        # output projection
        out_w=n(ks[14], (DEC_HID, VOCAB)),
        out_b=n(ks[15], (1, VOCAB)),
    )


def prepare_kernel_params(p):
    """One-time fusion / padding of raw params into fused-kernel operands."""
    # fuse Q_mu / Q_logvar into a single [mu | logvar] linear, split by the
    # encoder direction its input rows belong to (avoids an in-kernel concat).
    q_w = jnp.concatenate([p['q_mu_w'], p['q_lv_w']], axis=1)        # (2H, 2Z)
    q_b = jnp.concatenate([p['q_mu_b'], p['q_lv_b']], axis=1)        # (1, 2Z)
    # lane-dense output projection: pad vocab dim to 128; padded bias lanes get
    # NEG so they contribute exactly 0 to the softmax normalizer.
    out_w_pad = jnp.zeros((DEC_HID, VPAD), jnp.float32).at[:, :VOCAB].set(p['out_w'])
    out_b_pad = jnp.full((1, VPAD), NEG, jnp.float32).at[:, :VOCAB].set(p['out_b'])
    return dict(
        emb=p['emb'],
        enc_wf_ih=p['enc_wf_ih'], enc_wf_hh=p['enc_wf_hh'], enc_bf=p['enc_bf'],
        enc_wb_ih=p['enc_wb_ih'], enc_wb_hh=p['enc_wb_hh'], enc_bb=p['enc_bb'],
        q_w_fwd=q_w[:ENC_HID], q_w_bwd=q_w[ENC_HID:], q_b=q_b,
        dec_w_ih=p['dec_w_ih'], dec_w_hh=p['dec_w_hh'], dec_b=p['dec_b'],
        out_w_pad=out_w_pad, out_b_pad=out_b_pad,
    )


# ---------------------------------- main ------------------------------------
if __name__ == "__main__":
    root = jax.random.PRNGKey(0)
    k_params, k_src, k_trg, k_fwd = jax.random.split(root, 4)

    kernel_params = prepare_kernel_params(init_params(k_params))
    src = jax.random.randint(k_src, (SEQ, BATCH), 0, VOCAB, dtype=jnp.int32)
    trg = jax.random.randint(k_trg, (SEQ, BATCH), 0, VOCAB, dtype=jnp.int32)

    dec_logs, mu, logvar = sequence_vae_forward(kernel_params, src, trg, k_fwd)
    jax.block_until_ready((dec_logs, mu, logvar))

    assert dec_logs.shape == (SEQ * BATCH, VOCAB)
    assert mu.shape == (BATCH, Z_DIM) and logvar.shape == (BATCH, Z_DIM)
    assert bool(jnp.all(jnp.isfinite(dec_logs)))
    # log_softmax rows must exponentiate-sum to 1
    row_sums = jnp.sum(jnp.exp(dec_logs), axis=-1)
    assert bool(jnp.all(jnp.abs(row_sums - 1.0) < 1e-4))
    print("KERNEL_OK")
</pallas_src>

<mosaic_0001>
module attributes {stable_mosaic.version = 11 : i64} {
  func.func @_sequence_vae_kernel(%arg0: memref<16x1xi32, #tpu.memory_space<vmem>>, %arg1: memref<16x1xi32, #tpu.memory_space<vmem>>, %arg2: memref<32x32xf32, #tpu.memory_space<vmem>>, %arg3: memref<32x128xf32, #tpu.memory_space<vmem>>, %arg4: memref<32x128xf32, #tpu.memory_space<vmem>>, %arg5: memref<1x128xf32, #tpu.memory_space<vmem>>, %arg6: memref<32x128xf32, #tpu.memory_space<vmem>>, %arg7: memref<32x128xf32, #tpu.memory_space<vmem>>, %arg8: memref<1x128xf32, #tpu.memory_space<vmem>>, %arg9: memref<32x64xf32, #tpu.memory_space<vmem>>, %arg10: memref<32x64xf32, #tpu.memory_space<vmem>>, %arg11: memref<1x64xf32, #tpu.memory_space<vmem>>, %arg12: memref<32x128xf32, #tpu.memory_space<vmem>>, %arg13: memref<32x128xf32, #tpu.memory_space<vmem>>, %arg14: memref<1x128xf32, #tpu.memory_space<vmem>>, %arg15: memref<32x128xf32, #tpu.memory_space<vmem>>, %arg16: memref<1x128xf32, #tpu.memory_space<vmem>>, %arg17: memref<2x32xf32, #tpu.memory_space<vmem>>, %arg18: memref<2x32xf32, #tpu.memory_space<vmem>>, %arg19: memref<16x128xf32, #tpu.memory_space<vmem>>, %arg20: memref<2x32xf32, #tpu.memory_space<vmem>>, %arg21: memref<2x32xf32, #tpu.memory_space<vmem>>, %arg22: memref<16x32xf32, #tpu.memory_space<vmem>>) attributes {dimension_semantics = [], scalar_prefetch = 0 : i64, scratch_operands = 1 : i64, tpu.core_type = #tpu.core_type<tc>} {
    %0 = tpu.iota {dimensions = array<i32: 1>} : vector<16x32xi32>
    %c0 = arith.constant 0 : index
    %c0_0 = arith.constant 0 : index
    %1 = vector.load %arg0[%c0, %c0_0] : memref<16x1xi32, #tpu.memory_space<vmem>>, vector<16x1xi32>
    %2 = vector.broadcast %1 : vector<16x1xi32> to vector<16x32xi32>
    %3 = arith.cmpi eq, %2, %0 : vector<16x32xi32>
    %cst = arith.constant 1.000000e+00 : f32
    %cst_1 = arith.constant 0.000000e+00 : f32
    %4 = vector.broadcast %cst : f32 to vector<16x32xf32>
    %5 = vector.broadcast %cst_1 : f32 to vector<16x32xf32>
    %6 = arith.select %3, %4, %5 : vector<16x32xi1>, vector<16x32xf32>
    %c0_2 = arith.constant 0 : index
    %c0_3 = arith.constant 0 : index
    %7 = vector.load %arg1[%c0_2, %c0_3] : memref<16x1xi32, #tpu.memory_space<vmem>>, vector<16x1xi32>
    %8 = vector.broadcast %7 : vector<16x1xi32> to vector<16x32xi32>
    %9 = arith.cmpi eq, %8, %0 : vector<16x32xi32>
    %cst_4 = arith.constant 1.000000e+00 : f32
    %cst_5 = arith.constant 0.000000e+00 : f32
    %10 = vector.broadcast %cst_4 : f32 to vector<16x32xf32>
    %11 = vector.broadcast %cst_5 : f32 to vector<16x32xf32>
    %12 = arith.select %9, %10, %11 : vector<16x32xi1>, vector<16x32xf32>
    %c0_6 = arith.constant 0 : index
    %c0_7 = arith.constant 0 : index
    %13 = vector.load %arg2[%c0_6, %c0_7] : memref<32x32xf32, #tpu.memory_space<vmem>>, vector<32x32xf32>
    %cst_8 = arith.constant dense<0.000000e+00> : vector<16x32xf32>
    %14 = tpu.matmul %6, %13, %cst_8 {dimension_numbers = #tpu.dot_dimension_numbers<[1], [0], [0], [1], [0, 0, 1, 1], [], []>} : vector<16x32xf32>, vector<32x32xf32>, vector<16x32xf32> -> vector<16x32xf32>
    %cst_9 = arith.constant dense<0.000000e+00> : vector<16x32xf32>
    %15 = tpu.matmul %12, %13, %cst_9 {dimension_numbers = #tpu.dot_dimension_numbers<[1], [0], [0], [1], [0, 0, 1, 1], [], []>} : vector<16x32xf32>, vector<32x32xf32>, vector<16x32xf32> -> vector<16x32xf32>
    %c0_10 = arith.constant 0 : index
    %c0_11 = arith.constant 0 : index
    %16 = vector.load %arg3[%c0_10, %c0_11] : memref<32x128xf32, #tpu.memory_space<vmem>>, vector<32x128xf32>
    %cst_12 = arith.constant dense<0.000000e+00> : vector<16x128xf32>
    %17 = tpu.matmul %14, %16, %cst_12 {dimension_numbers = #tpu.dot_dimension_numbers<[1], [0], [0], [1], [0, 0, 1, 1], [], []>} : vector<16x32xf32>, vector<32x128xf32>, vector<16x128xf32> -> vector<16x128xf32>
    %c0_13 = arith.constant 0 : index
    %c0_14 = arith.constant 0 : index
    %18 = vector.load %arg5[%c0_13, %c0_14] : memref<1x128xf32, #tpu.memory_space<vmem>>, vector<1x128xf32>
    %19 = vector.broadcast %18 : vector<1x128xf32> to vector<16x128xf32>
    %20 = arith.addf %17, %19 : vector<16x128xf32>
    %c0_15 = arith.constant 0 : index
    %c0_16 = arith.constant 0 : index
    %21 = vector.load %arg12[%c0_15, %c0_16] : memref<32x128xf32, #tpu.memory_space<vmem>>, vector<32x128xf32>
    %cst_17 = arith.constant dense<0.000000e+00> : vector<16x128xf32>
    %22 = tpu.matmul %15, %21, %cst_17 {dimension_numbers = #tpu.dot_dimension_numbers<[1], [0], [0], [1], [0, 0, 1, 1], [], []>} : vector<16x32xf32>, vector<32x128xf32>, vector<16x128xf32> -> vector<16x128xf32>
    %c0_18 = arith.constant 0 : index
    %c0_19 = arith.constant 0 : index
    %23 = vector.load %arg14[%c0_18, %c0_19] : memref<1x128xf32, #tpu.memory_space<vmem>>, vector<1x128xf32>
    %24 = vector.broadcast %23 : vector<1x128xf32> to vector<16x128xf32>
    %25 = arith.addf %22, %24 : vector<16x128xf32>
    %c0_20 = arith.constant 0 : index
    %c0_21 = arith.constant 0 : index
    %26 = vector.load %arg4[%c0_20, %c0_21] : memref<32x128xf32, #tpu.memory_space<vmem>>, vector<32x128xf32>
    %cst_22 = arith.constant 0.000000e+00 : f32
    %27 = vector.broadcast %cst_22 : f32 to vector<2x32xf32>
    %cst_23 = arith.constant 0.000000e+00 : f32
    %28 = vector.broadcast %cst_23 : f32 to vector<2x32xf32>
    %29 = vector.extract_strided_slice %20 {offsets = [0, 0], sizes = [2, 128], strides = [1, 1]} : vector<16x128xf32> to vector<2x128xf32>
    %cst_24 = arith.constant dense<0.000000e+00> : vector<2x128xf32>
    %30 = tpu.matmul %27, %26, %cst_24 {dimension_numbers = #tpu.dot_dimension_numbers<[1], [0], [0], [1], [0, 0, 1, 1], [], []>} : vector<2x32xf32>, vector<32x128xf32>, vector<2x128xf32> -> vector<2x128xf32>
    %31 = arith.addf %29, %30 : vector<2x128xf32>
    %32 = arith.negf %31 : vector<2x128xf32>
    %33 = math.exp %32 : vector<2x128xf32>
    %cst_25 = arith.constant 1.000000e+00 : f32
    %34 = vector.broadcast %cst_25 : f32 to vector<2x128xf32>
    %35 = arith.addf %34, %33 : vector<2x128xf32>
    %36 = arith.divf %34, %35 : vector<2x128xf32>
    %37 = math.tanh %31 : vector<2x128xf32>
    %38 = vector.extract_strided_slice %36 {offsets = [0, 0], sizes = [2, 32], strides = [1, 1]} : vector<2x128xf32> to vector<2x32xf32>
    %39 = vector.extract_strided_slice %36 {offsets = [0, 32], sizes = [2, 32], strides = [1, 1]} : vector<2x128xf32> to vector<2x32xf32>
    %40 = vector.extract_strided_slice %37 {offsets = [0, 64], sizes = [2, 32], strides = [1, 1]} : vector<2x128xf32> to vector<2x32xf32>
    %41 = vector.extract_strided_slice %36 {offsets = [0, 96], sizes = [2, 32], strides = [1, 1]} : vector<2x128xf32> to vector<2x32xf32>
    %42 = arith.mulf %39, %28 : vector<2x32xf32>
    %43 = arith.mulf %38, %40 : vector<2x32xf32>
    %44 = arith.addf %42, %43 : vector<2x32xf32>
    %45 = math.tanh %44 : vector<2x32xf32>
    %46 = arith.mulf %41, %45 : vector<2x32xf32>
    %47 = vector.extract_strided_slice %20 {offsets = [2, 0], sizes = [2, 128], strides = [1, 1]} : vector<16x128xf32> to vector<2x128xf32>
    %cst_26 = arith.constant dense<0.000000e+00> : vector<2x128xf32>
    %48 = tpu.matmul %46, %26, %cst_26 {dimension_numbers = #tpu.dot_dimension_numbers<[1], [0], [0], [1], [0, 0, 1, 1], [], []>} : vector<2x32xf32>, vector<32x128xf32>, vector<2x128xf32> -> vector<2x128xf32>
    %49 = arith.addf %47, %48 : vector<2x128xf32>
    %50 = arith.negf %49 : vector<2x128xf32>
    %51 = math.exp %50 : vector<2x128xf32>
    %cst_27 = arith.constant 1.000000e+00 : f32
    %52 = vector.broadcast %cst_27 : f32 to vector<2x128xf32>
    %53 = arith.addf %52, %51 : vector<2x128xf32>
    %54 = arith.divf %52, %53 : vector<2x128xf32>
    %55 = math.tanh %49 : vector<2x128xf32>
    %56 = vector.extract_strided_slice %54 {offsets = [0, 0], sizes = [2, 32], strides = [1, 1]} : vector<2x128xf32> to vector<2x32xf32>
    %57 = vector.extract_strided_slice %54 {offsets = [0, 32], sizes = [2, 32], strides = [1, 1]} : vector<2x128xf32> to vector<2x32xf32>
    %58 = vector.extract_strided_slice %55 {offsets = [0, 64], sizes = [2, 32], strides = [1, 1]} : vector<2x128xf32> to vector<2x32xf32>
    %59 = vector.extract_strided_slice %54 {offsets = [0, 96], sizes = [2, 32], strides = [1, 1]} : vector<2x128xf32> to vector<2x32xf32>
    %60 = arith.mulf %57, %44 : vector<2x32xf32>
    %61 = arith.mulf %56, %58 : vector<2x32xf32>
    %62 = arith.addf %60, %61 : vector<2x32xf32>
    %63 = math.tanh %62 : vector<2x32xf32>
    %64 = arith.mulf %59, %63 : vector<2x32xf32>
    %65 = vector.extract_strided_slice %20 {offsets = [4, 0], sizes = [2, 128], strides = [1, 1]} : vector<16x128xf32> to vector<2x128xf32>
    %cst_28 = arith.constant dense<0.000000e+00> : vector<2x128xf32>
    %66 = tpu.matmul %64, %26, %cst_28 {dimension_numbers = #tpu.dot_dimension_numbers<[1], [0], [0], [1], [0, 0, 1, 1], [], []>} : vector<2x32xf32>, vector<32x128xf32>, vector<2x128xf32> -> vector<2x128xf32>
    %67 = arith.addf %65, %66 : vector<2x128xf32>
    %68 = arith.negf %67 : vector<2x128xf32>
    %69 = math.exp %68 : vector<2x128xf32>
    %cst_29 = arith.constant 1.000000e+00 : f32
    %70 = vector.broadcast %cst_29 : f32 to vector<2x128xf32>
    %71 = arith.addf %70, %69 : vector<2x128xf32>
    %72 = arith.divf %70, %71 : vector<2x128xf32>
    %73 = math.tanh %67 : vector<2x128xf32>
    %74 = vector.extract_strided_slice %72 {offsets = [0, 0], sizes = [2, 32], strides = [1, 1]} : vector<2x128xf32> to vector<2x32xf32>
    %75 = vector.extract_strided_slice %72 {offsets = [0, 32], sizes = [2, 32], strides = [1, 1]} : vector<2x128xf32> to vector<2x32xf32>
    %76 = vector.extract_strided_slice %73 {offsets = [0, 64], sizes = [2, 32], strides = [1, 1]} : vector<2x128xf32> to vector<2x32xf32>
    %77 = vector.extract_strided_slice %72 {offsets = [0, 96], sizes = [2, 32], strides = [1, 1]} : vector<2x128xf32> to vector<2x32xf32>
    %78 = arith.mulf %75, %62 : vector<2x32xf32>
    %79 = arith.mulf %74, %76 : vector<2x32xf32>
    %80 = arith.addf %78, %79 : vector<2x32xf32>
    %81 = math.tanh %80 : vector<2x32xf32>
    %82 = arith.mulf %77, %81 : vector<2x32xf32>
    %83 = vector.extract_strided_slice %20 {offsets = [6, 0], sizes = [2, 128], strides = [1, 1]} : vector<16x128xf32> to vector<2x128xf32>
    %cst_30 = arith.constant dense<0.000000e+00> : vector<2x128xf32>
    %84 = tpu.matmul %82, %26, %cst_30 {dimension_numbers = #tpu.dot_dimension_numbers<[1], [0], [0], [1], [0, 0, 1, 1], [], []>} : vector<2x32xf32>, vector<32x128xf32>, vector<2x128xf32> -> vector<2x128xf32>
    %85 = arith.addf %83, %84 : vector<2x128xf32>
    %86 = arith.negf %85 : vector<2x128xf32>
    %87 = math.exp %86 : vector<2x128xf32>
    %cst_31 = arith.constant 1.000000e+00 : f32
    %88 = vector.broadcast %cst_31 : f32 to vector<2x128xf32>
    %89 = arith.addf %88, %87 : vector<2x128xf32>
    %90 = arith.divf %88, %89 : vector<2x128xf32>
    %91 = math.tanh %85 : vector<2x128xf32>
    %92 = vector.extract_strided_slice %90 {offsets = [0, 0], sizes = [2, 32], strides = [1, 1]} : vector<2x128xf32> to vector<2x32xf32>
    %93 = vector.extract_strided_slice %90 {offsets = [0, 32], sizes = [2, 32], strides = [1, 1]} : vector<2x128xf32> to vector<2x32xf32>
    %94 = vector.extract_strided_slice %91 {offsets = [0, 64], sizes = [2, 32], strides = [1, 1]} : vector<2x128xf32> to vector<2x32xf32>
    %95 = vector.extract_strided_slice %90 {offsets = [0, 96], sizes = [2, 32], strides = [1, 1]} : vector<2x128xf32> to vector<2x32xf32>
    %96 = arith.mulf %93, %80 : vector<2x32xf32>
    %97 = arith.mulf %92, %94 : vector<2x32xf32>
    %98 = arith.addf %96, %97 : vector<2x32xf32>
    %99 = math.tanh %98 : vector<2x32xf32>
    %100 = arith.mulf %95, %99 : vector<2x32xf32>
    %101 = vector.extract_strided_slice %20 {offsets = [8, 0], sizes = [2, 128], strides = [1, 1]} : vector<16x128xf32> to vector<2x128xf32>
    %cst_32 = arith.constant dense<0.000000e+00> : vector<2x128xf32>
    %102 = tpu.matmul %100, %26, %cst_32 {dimension_numbers = #tpu.dot_dimension_numbers<[1], [0], [0], [1], [0, 0, 1, 1], [], []>} : vector<2x32xf32>, vector<32x128xf32>, vector<2x128xf32> -> vector<2x128xf32>
    %103 = arith.addf %101, %102 : vector<2x128xf32>
    %104 = arith.negf %103 : vector<2x128xf32>
    %105 = math.exp %104 : vector<2x128xf32>
    %cst_33 = arith.constant 1.000000e+00 : f32
    %106 = vector.broadcast %cst_33 : f32 to vector<2x128xf32>
    %107 = arith.addf %106, %105 : vector<2x128xf32>
    %108 = arith.divf %106, %107 : vector<2x128xf32>
    %109 = math.tanh %103 : vector<2x128xf32>
    %110 = vector.extract_strided_slice %108 {offsets = [0, 0], sizes = [2, 32], strides = [1, 1]} : vector<2x128xf32> to vector<2x32xf32>
    %111 = vector.extract_strided_slice %108 {offsets = [0, 32], sizes = [2, 32], strides = [1, 1]} : vector<2x128xf32> to vector<2x32xf32>
    %112 = vector.extract_strided_slice %109 {offsets = [0, 64], sizes = [2, 32], strides = [1, 1]} : vector<2x128xf32> to vector<2x32xf32>
    %113 = vector.extract_strided_slice %108 {offsets = [0, 96], sizes = [2, 32], strides = [1, 1]} : vector<2x128xf32> to vector<2x32xf32>
    %114 = arith.mulf %111, %98 : vector<2x32xf32>
    %115 = arith.mulf %110, %112 : vector<2x32xf32>
    %116 = arith.addf %114, %115 : vector<2x32xf32>
    %117 = math.tanh %116 : vector<2x32xf32>
    %118 = arith.mulf %113, %117 : vector<2x32xf32>
    %119 = vector.extract_strided_slice %20 {offsets = [10, 0], sizes = [2, 128], strides = [1, 1]} : vector<16x128xf32> to vector<2x128xf32>
    %cst_34 = arith.constant dense<0.000000e+00> : vector<2x128xf32>
    %120 = tpu.matmul %118, %26, %cst_34 {dimension_numbers = #tpu.dot_dimension_numbers<[1], [0], [0], [1], [0, 0, 1, 1], [], []>} : vector<2x32xf32>, vector<32x128xf32>, vector<2x128xf32> -> vector<2x128xf32>
    %121 = arith.addf %119, %120 : vector<2x128xf32>
    %122 = arith.negf %121 : vector<2x128xf32>
    %123 = math.exp %122 : vector<2x128xf32>
    %cst_35 = arith.constant 1.000000e+00 : f32
    %124 = vector.broadcast %cst_35 : f32 to vector<2x128xf32>
    %125 = arith.addf %124, %123 : vector<2x128xf32>
    %126 = arith.divf %124, %125 : vector<2x128xf32>
    %127 = math.tanh %121 : vector<2x128xf32>
    %128 = vector.extract_strided_slice %126 {offsets = [0, 0], sizes = [2, 32], strides = [1, 1]} : vector<2x128xf32> to vector<2x32xf32>
    %129 = vector.extract_strided_slice %126 {offsets = [0, 32], sizes = [2, 32], strides = [1, 1]} : vector<2x128xf32> to vector<2x32xf32>
    %130 = vector.extract_strided_slice %127 {offsets = [0, 64], sizes = [2, 32], strides = [1, 1]} : vector<2x128xf32> to vector<2x32xf32>
    %131 = vector.extract_strided_slice %126 {offsets = [0, 96], sizes = [2, 32], strides = [1, 1]} : vector<2x128xf32> to vector<2x32xf32>
    %132 = arith.mulf %129, %116 : vector<2x32xf32>
    %133 = arith.mulf %128, %130 : vector<2x32xf32>
    %134 = arith.addf %132, %133 : vector<2x32xf32>
    %135 = math.tanh %134 : vector<2x32xf32>
    %136 = arith.mulf %131, %135 : vector<2x32xf32>
    %137 = vector.extract_strided_slice %20 {offsets = [12, 0], sizes = [2, 128], strides = [1, 1]} : vector<16x128xf32> to vector<2x128xf32>
    %cst_36 = arith.constant dense<0.000000e+00> : vector<2x128xf32>
    %138 = tpu.matmul %136, %26, %cst_36 {dimension_numbers = #tpu.dot_dimension_numbers<[1], [0], [0], [1], [0, 0, 1, 1], [], []>} : vector<2x32xf32>, vector<32x128xf32>, vector<2x128xf32> -> vector<2x128xf32>
    %139 = arith.addf %137, %138 : vector<2x128xf32>
    %140 = arith.negf %139 : vector<2x128xf32>
    %141 = math.exp %140 : vector<2x128xf32>
    %cst_37 = arith.constant 1.000000e+00 : f32
    %142 = vector.broadcast %cst_37 : f32 to vector<2x128xf32>
    %143 = arith.addf %142, %141 : vector<2x128xf32>
    %144 = arith.divf %142, %143 : vector<2x128xf32>
    %145 = math.tanh %139 : vector<2x128xf32>
    %146 = vector.extract_strided_slice %144 {offsets = [0, 0], sizes = [2, 32], strides = [1, 1]} : vector<2x128xf32> to vector<2x32xf32>
    %147 = vector.extract_strided_slice %144 {offsets = [0, 32], sizes = [2, 32], strides = [1, 1]} : vector<2x128xf32> to vector<2x32xf32>
    %148 = vector.extract_strided_slice %145 {offsets = [0, 64], sizes = [2, 32], strides = [1, 1]} : vector<2x128xf32> to vector<2x32xf32>
    %149 = vector.extract_strided_slice %144 {offsets = [0, 96], sizes = [2, 32], strides = [1, 1]} : vector<2x128xf32> to vector<2x32xf32>
    %150 = arith.mulf %147, %134 : vector<2x32xf32>
    %151 = arith.mulf %146, %148 : vector<2x32xf32>
    %152 = arith.addf %150, %151 : vector<2x32xf32>
    %153 = math.tanh %152 : vector<2x32xf32>
    %154 = arith.mulf %149, %153 : vector<2x32xf32>
    %155 = vector.extract_strided_slice %20 {offsets = [14, 0], sizes = [2, 128], strides = [1, 1]} : vector<16x128xf32> to vector<2x128xf32>
    %cst_38 = arith.constant dense<0.000000e+00> : vector<2x128xf32>
    %156 = tpu.matmul %154, %26, %cst_38 {dimension_numbers = #tpu.dot_dimension_numbers<[1], [0], [0], [1], [0, 0, 1, 1], [], []>} : vector<2x32xf32>, vector<32x128xf32>, vector<2x128xf32> -> vector<2x128xf32>
    %157 = arith.addf %155, %156 : vector<2x128xf32>
    %158 = arith.negf %157 : vector<2x128xf32>
    %159 = math.exp %158 : vector<2x128xf32>
    %cst_39 = arith.constant 1.000000e+00 : f32
    %160 = vector.broadcast %cst_39 : f32 to vector<2x128xf32>
    %161 = arith.addf %160, %159 : vector<2x128xf32>
    %162 = arith.divf %160, %161 : vector<2x128xf32>
    %163 = math.tanh %157 : vector<2x128xf32>
    %164 = vector.extract_strided_slice %162 {offsets = [0, 0], sizes = [2, 32], strides = [1, 1]} : vector<2x128xf32> to vector<2x32xf32>
    %165 = vector.extract_strided_slice %162 {offsets = [0, 32], sizes = [2, 32], strides = [1, 1]} : vector<2x128xf32> to vector<2x32xf32>
    %166 = vector.extract_strided_slice %163 {offsets = [0, 64], sizes = [2, 32], strides = [1, 1]} : vector<2x128xf32> to vector<2x32xf32>
    %167 = vector.extract_strided_slice %162 {offsets = [0, 96], sizes = [2, 32], strides = [1, 1]} : vector<2x128xf32> to vector<2x32xf32>
    %168 = arith.mulf %165, %152 : vector<2x32xf32>
    %169 = arith.mulf %164, %166 : vector<2x32xf32>
    %170 = arith.addf %168, %169 : vector<2x32xf32>
    %171 = math.tanh %170 : vector<2x32xf32>
    %172 = arith.mulf %167, %171 : vector<2x32xf32>
    %173 = vector.extract_strided_slice %14 {offsets = [14, 0], sizes = [2, 32], strides = [1, 1]} : vector<16x32xf32> to vector<2x32xf32>
    %c0_40 = arith.constant 0 : index
    %c0_41 = arith.constant 0 : index
    %174 = vector.load %arg6[%c0_40, %c0_41] : memref<32x128xf32, #tpu.memory_space<vmem>>, vector<32x128xf32>
    %cst_42 = arith.constant dense<0.000000e+00> : vector<2x128xf32>
    %175 = tpu.matmul %173, %174, %cst_42 {dimension_numbers = #tpu.dot_dimension_numbers<[1], [0], [0], [1], [0, 0, 1, 1], [], []>} : vector<2x32xf32>, vector<32x128xf32>, vector<2x128xf32> -> vector<2x128xf32>
    %c0_43 = arith.constant 0 : index
    %c0_44 = arith.constant 0 : index
    %176 = vector.load %arg8[%c0_43, %c0_44] : memref<1x128xf32, #tpu.memory_space<vmem>>, vector<1x128xf32>
    %177 = vector.broadcast %176 : vector<1x128xf32> to vector<2x128xf32>
    %178 = arith.addf %175, %177 : vector<2x128xf32>
    %cst_45 = arith.constant 0.000000e+00 : f32
    %179 = vector.broadcast %cst_45 : f32 to vector<2x32xf32>
    %180 = arith.negf %178 : vector<2x128xf32>
    %181 = math.exp %180 : vector<2x128xf32>
    %cst_46 = arith.constant 1.000000e+00 : f32
    %182 = vector.broadcast %cst_46 : f32 to vector<2x128xf32>
    %183 = arith.addf %182, %181 : vector<2x128xf32>
    %184 = arith.divf %182, %183 : vector<2x128xf32>
    %185 = math.tanh %178 : vector<2x128xf32>
    %186 = vector.extract_strided_slice %184 {offsets = [0, 0], sizes = [2, 32], strides = [1, 1]} : vector<2x128xf32> to vector<2x32xf32>
    %187 = vector.extract_strided_slice %184 {offsets = [0, 32], sizes = [2, 32], strides = [1, 1]} : vector<2x128xf32> to vector<2x32xf32>
    %188 = vector.extract_strided_slice %185 {offsets = [0, 64], sizes = [2, 32], strides = [1, 1]} : vector<2x128xf32> to vector<2x32xf32>
    %189 = vector.extract_strided_slice %184 {offsets = [0, 96], sizes = [2, 32], strides = [1, 1]} : vector<2x128xf32> to vector<2x32xf32>
    %190 = arith.mulf %187, %179 : vector<2x32xf32>
    %191 = arith.mulf %186, %188 : vector<2x32xf32>
    %192 = arith.addf %190, %191 : vector<2x32xf32>
    %193 = math.tanh %192 : vector<2x32xf32>
    %194 = arith.mulf %189, %193 : vector<2x32xf32>
    %c0_47 = arith.constant 0 : index
    %c0_48 = arith.constant 0 : index
    %195 = vector.load %arg9[%c0_47, %c0_48] : memref<32x64xf32, #tpu.memory_space<vmem>>, vector<32x64xf32>
    %cst_49 = arith.constant dense<0.000000e+00> : vector<2x64xf32>
    %196 = tpu.matmul %172, %195, %cst_49 {dimension_numbers = #tpu.dot_dimension_numbers<[1], [0], [0], [1], [0, 0, 1, 1], [], []>} : vector<2x32xf32>, vector<32x64xf32>, vector<2x64xf32> -> vector<2x64xf32>
    %c0_50 = arith.constant 0 : index
    %c0_51 = arith.constant 0 : index
    %197 = vector.load %arg10[%c0_50, %c0_51] : memref<32x64xf32, #tpu.memory_space<vmem>>, vector<32x64xf32>
    %cst_52 = arith.constant dense<0.000000e+00> : vector<2x64xf32>
    %198 = tpu.matmul %194, %197, %cst_52 {dimension_numbers = #tpu.dot_dimension_numbers<[1], [0], [0], [1], [0, 0, 1, 1], [], []>} : vector<2x32xf32>, vector<32x64xf32>, vector<2x64xf32> -> vector<2x64xf32>
    %199 = arith.addf %196, %198 : vector<2x64xf32>
    %c0_53 = arith.constant 0 : index
    %c0_54 = arith.constant 0 : index
    %200 = vector.load %arg11[%c0_53, %c0_54] : memref<1x64xf32, #tpu.memory_space<vmem>>, vector<1x64xf32>
    %201 = vector.broadcast %200 : vector<1x64xf32> to vector<2x64xf32>
    %202 = arith.addf %199, %201 : vector<2x64xf32>
    %203 = vector.extract_strided_slice %202 {offsets = [0, 0], sizes = [2, 32], strides = [1, 1]} : vector<2x64xf32> to vector<2x32xf32>
    %204 = vector.extract_strided_slice %202 {offsets = [0, 32], sizes = [2, 32], strides = [1, 1]} : vector<2x64xf32> to vector<2x32xf32>
    %c0_55 = arith.constant 0 : index
    %c0_56 = arith.constant 0 : index
    %205 = vector.load %arg17[%c0_55, %c0_56] : memref<2x32xf32, #tpu.memory_space<vmem>>, vector<2x32xf32>
    %cst_57 = arith.constant 5.000000e-01 : f32
    %206 = vector.broadcast %cst_57 : f32 to vector<2x32xf32>
    %207 = arith.mulf %206, %204 : vector<2x32xf32>
    %208 = math.exp %207 : vector<2x32xf32>
    %209 = arith.mulf %205, %208 : vector<2x32xf32>
    %210 = arith.addf %203, %209 : vector<2x32xf32>
    %c0_58 = arith.constant 0 : index
    %c0_59 = arith.constant 0 : index
    %211 = vector.load %arg20[%c0_58, %c0_59] : memref<2x32xf32, #tpu.memory_space<vmem>>, vector<2x32xf32>
    tpu.vector_store %arg20[%c0_58, %c0_59], %203 {strides = array<i32>} : memref<2x32xf32, #tpu.memory_space<vmem>>, vector<2x32xf32>,
    %c0_60 = arith.constant 0 : index
    %c0_61 = arith.constant 0 : index
    %212 = vector.load %arg21[%c0_60, %c0_61] : memref<2x32xf32, #tpu.memory_space<vmem>>, vector<2x32xf32>
    tpu.vector_store %arg21[%c0_60, %c0_61], %204 {strides = array<i32>} : memref<2x32xf32, #tpu.memory_space<vmem>>, vector<2x32xf32>,
    %c0_62 = arith.constant 0 : index
    %c0_63 = arith.constant 0 : index
    %213 = vector.load %arg13[%c0_62, %c0_63] : memref<32x128xf32, #tpu.memory_space<vmem>>, vector<32x128xf32>
    %c0_64 = arith.constant 0 : index
    %c0_65 = arith.constant 0 : index
    %214 = vector.load %arg18[%c0_64, %c0_65] : memref<2x32xf32, #tpu.memory_space<vmem>>, vector<2x32xf32>
    %215 = vector.extract_strided_slice %25 {offsets = [0, 0], sizes = [2, 128], strides = [1, 1]} : vector<16x128xf32> to vector<2x128xf32>
    %cst_66 = arith.constant dense<0.000000e+00> : vector<2x128xf32>
    %216 = tpu.matmul %210, %213, %cst_66 {dimension_numbers = #tpu.dot_dimension_numbers<[1], [0], [0], [1], [0, 0, 1, 1], [], []>} : vector<2x32xf32>, vector<32x128xf32>, vector<2x128xf32> -> vector<2x128xf32>
    %217 = arith.addf %215, %216 : vector<2x128xf32>
    %218 = arith.negf %217 : vector<2x128xf32>
    %219 = math.exp %218 : vector<2x128xf32>
    %cst_67 = arith.constant 1.000000e+00 : f32
    %220 = vector.broadcast %cst_67 : f32 to vector<2x128xf32>
    %221 = arith.addf %220, %219 : vector<2x128xf32>
    %222 = arith.divf %220, %221 : vector<2x128xf32>
    %223 = math.tanh %217 : vector<2x128xf32>
    %224 = vector.extract_strided_slice %222 {offsets = [0, 0], sizes = [2, 32], strides = [1, 1]} : vector<2x128xf32> to vector<2x32xf32>
    %225 = vector.extract_strided_slice %222 {offsets = [0, 32], sizes = [2, 32], strides = [1, 1]} : vector<2x128xf32> to vector<2x32xf32>
    %226 = vector.extract_strided_slice %223 {offsets = [0, 64], sizes = [2, 32], strides = [1, 1]} : vector<2x128xf32> to vector<2x32xf32>
    %227 = vector.extract_strided_slice %222 {offsets = [0, 96], sizes = [2, 32], strides = [1, 1]} : vector<2x128xf32> to vector<2x32xf32>
    %228 = arith.mulf %225, %214 : vector<2x32xf32>
    %229 = arith.mulf %224, %226 : vector<2x32xf32>
    %230 = arith.addf %228, %229 : vector<2x32xf32>
    %231 = math.tanh %230 : vector<2x32xf32>
    %232 = arith.mulf %227, %231 : vector<2x32xf32>
    %c0_68 = arith.constant 0 : index
    %c0_69 = arith.constant 0 : index
    %233 = vector.load %arg22[%c0_68, %c0_69] : memref<16x32xf32, #tpu.memory_space<vmem>>, vector<2x32xf32>
    tpu.vector_store %arg22[%c0_68, %c0_69], %232 {strides = array<i32>} : memref<16x32xf32, #tpu.memory_space<vmem>>, vector<2x32xf32>,
    %234 = vector.extract_strided_slice %25 {offsets = [2, 0], sizes = [2, 128], strides = [1, 1]} : vector<16x128xf32> to vector<2x128xf32>
    %cst_70 = arith.constant dense<0.000000e+00> : vector<2x128xf32>
    %235 = tpu.matmul %232, %213, %cst_70 {dimension_numbers = #tpu.dot_dimension_numbers<[1], [0], [0], [1], [0, 0, 1, 1], [], []>} : vector<2x32xf32>, vector<32x128xf32>, vector<2x128xf32> -> vector<2x128xf32>
    %236 = arith.addf %234, %235 : vector<2x128xf32>
    %237 = arith.negf %236 : vector<2x128xf32>
    %238 = math.exp %237 : vector<2x128xf32>
    %cst_71 = arith.constant 1.000000e+00 : f32
    %239 = vector.broadcast %cst_71 : f32 to vector<2x128xf32>
    %240 = arith.addf %239, %238 : vector<2x128xf32>
    %241 = arith.divf %239, %240 : vector<2x128xf32>
    %242 = math.tanh %236 : vector<2x128xf32>
    %243 = vector.extract_strided_slice %241 {offsets = [0, 0], sizes = [2, 32], strides = [1, 1]} : vector<2x128xf32> to vector<2x32xf32>
    %244 = vector.extract_strided_slice %241 {offsets = [0, 32], sizes = [2, 32], strides = [1, 1]} : vector<2x128xf32> to vector<2x32xf32>
    %245 = vector.extract_strided_slice %242 {offsets = [0, 64], sizes = [2, 32], strides = [1, 1]} : vector<2x128xf32> to vector<2x32xf32>
    %246 = vector.extract_strided_slice %241 {offsets = [0, 96], sizes = [2, 32], strides = [1, 1]} : vector<2x128xf32> to vector<2x32xf32>
    %247 = arith.mulf %244, %230 : vector<2x32xf32>
    %248 = arith.mulf %243, %245 : vector<2x32xf32>
    %249 = arith.addf %247, %248 : vector<2x32xf32>
    %250 = math.tanh %249 : vector<2x32xf32>
    %251 = arith.mulf %246, %250 : vector<2x32xf32>
    %c2 = arith.constant 2 : index
    %c0_72 = arith.constant 0 : index
    %252 = vector.load %arg22[%c2, %c0_72] : memref<16x32xf32, #tpu.memory_space<vmem>>, vector<2x32xf32>
    tpu.vector_store %arg22[%c2, %c0_72], %251 {strides = array<i32>} : memref<16x32xf32, #tpu.memory_space<vmem>>, vector<2x32xf32>,
    %253 = vector.extract_strided_slice %25 {offsets = [4, 0], sizes = [2, 128], strides = [1, 1]} : vector<16x128xf32> to vector<2x128xf32>
    %cst_73 = arith.constant dense<0.000000e+00> : vector<2x128xf32>
    %254 = tpu.matmul %251, %213, %cst_73 {dimension_numbers = #tpu.dot_dimension_numbers<[1], [0], [0], [1], [0, 0, 1, 1], [], []>} : vector<2x32xf32>, vector<32x128xf32>, vector<2x128xf32> -> vector<2x128xf32>
    %255 = arith.addf %253, %254 : vector<2x128xf32>
    %256 = arith.negf %255 : vector<2x128xf32>
    %257 = math.exp %256 : vector<2x128xf32>
    %cst_74 = arith.constant 1.000000e+00 : f32
    %258 = vector.broadcast %cst_74 : f32 to vector<2x128xf32>
    %259 = arith.addf %258, %257 : vector<2x128xf32>
    %260 = arith.divf %258, %259 : vector<2x128xf32>
    %261 = math.tanh %255 : vector<2x128xf32>
    %262 = vector.extract_strided_slice %260 {offsets = [0, 0], sizes = [2, 32], strides = [1, 1]} : vector<2x128xf32> to vector<2x32xf32>
    %263 = vector.extract_strided_slice %260 {offsets = [0, 32], sizes = [2, 32], strides = [1, 1]} : vector<2x128xf32> to vector<2x32xf32>
    %264 = vector.extract_strided_slice %261 {offsets = [0, 64], sizes = [2, 32], strides = [1, 1]} : vector<2x128xf32> to vector<2x32xf32>
    %265 = vector.extract_strided_slice %260 {offsets = [0, 96], sizes = [2, 32], strides = [1, 1]} : vector<2x128xf32> to vector<2x32xf32>
    %266 = arith.mulf %263, %249 : vector<2x32xf32>
    %267 = arith.mulf %262, %264 : vector<2x32xf32>
    %268 = arith.addf %266, %267 : vector<2x32xf32>
    %269 = math.tanh %268 : vector<2x32xf32>
    %270 = arith.mulf %265, %269 : vector<2x32xf32>
    %c4 = arith.constant 4 : index
    %c0_75 = arith.constant 0 : index
    %271 = vector.load %arg22[%c4, %c0_75] : memref<16x32xf32, #tpu.memory_space<vmem>>, vector<2x32xf32>
    tpu.vector_store %arg22[%c4, %c0_75], %270 {strides = array<i32>} : memref<16x32xf32, #tpu.memory_space<vmem>>, vector<2x32xf32>,
    %272 = vector.extract_strided_slice %25 {offsets = [6, 0], sizes = [2, 128], strides = [1, 1]} : vector<16x128xf32> to vector<2x128xf32>
    %cst_76 = arith.constant dense<0.000000e+00> : vector<2x128xf32>
    %273 = tpu.matmul %270, %213, %cst_76 {dimension_numbers = #tpu.dot_dimension_numbers<[1], [0], [0], [1], [0, 0, 1, 1], [], []>} : vector<2x32xf32>, vector<32x128xf32>, vector<2x128xf32> -> vector<2x128xf32>
    %274 = arith.addf %272, %273 : vector<2x128xf32>
    %275 = arith.negf %274 : vector<2x128xf32>
    %276 = math.exp %275 : vector<2x128xf32>
    %cst_77 = arith.constant 1.000000e+00 : f32
    %277 = vector.broadcast %cst_77 : f32 to vector<2x128xf32>
    %278 = arith.addf %277, %276 : vector<2x128xf32>
    %279 = arith.divf %277, %278 : vector<2x128xf32>
    %280 = math.tanh %274 : vector<2x128xf32>
    %281 = vector.extract_strided_slice %279 {offsets = [0, 0], sizes = [2, 32], strides = [1, 1]} : vector<2x128xf32> to vector<2x32xf32>
    %282 = vector.extract_strided_slice %279 {offsets = [0, 32], sizes = [2, 32], strides = [1, 1]} : vector<2x128xf32> to vector<2x32xf32>
    %283 = vector.extract_strided_slice %280 {offsets = [0, 64], sizes = [2, 32], strides = [1, 1]} : vector<2x128xf32> to vector<2x32xf32>
    %284 = vector.extract_strided_slice %279 {offsets = [0, 96], sizes = [2, 32], strides = [1, 1]} : vector<2x128xf32> to vector<2x32xf32>
    %285 = arith.mulf %282, %268 : vector<2x32xf32>
    %286 = arith.mulf %281, %283 : vector<2x32xf32>
    %287 = arith.addf %285, %286 : vector<2x32xf32>
    %288 = math.tanh %287 : vector<2x32xf32>
    %289 = arith.mulf %284, %288 : vector<2x32xf32>
    %c6 = arith.constant 6 : index
    %c0_78 = arith.constant 0 : index
    %290 = vector.load %arg22[%c6, %c0_78] : memref<16x32xf32, #tpu.memory_space<vmem>>, vector<2x32xf32>
    tpu.vector_store %arg22[%c6, %c0_78], %289 {strides = array<i32>} : memref<16x32xf32, #tpu.memory_space<vmem>>, vector<2x32xf32>,
    %291 = vector.extract_strided_slice %25 {offsets = [8, 0], sizes = [2, 128], strides = [1, 1]} : vector<16x128xf32> to vector<2x128xf32>
    %cst_79 = arith.constant dense<0.000000e+00> : vector<2x128xf32>
    %292 = tpu.matmul %289, %213, %cst_79 {dimension_numbers = #tpu.dot_dimension_numbers<[1], [0], [0], [1], [0, 0, 1, 1], [], []>} : vector<2x32xf32>, vector<32x128xf32>, vector<2x128xf32> -> vector<2x128xf32>
    %293 = arith.addf %291, %292 : vector<2x128xf32>
    %294 = arith.negf %293 : vector<2x128xf32>
    %295 = math.exp %294 : vector<2x128xf32>
    %cst_80 = arith.constant 1.000000e+00 : f32
    %296 = vector.broadcast %cst_80 : f32 to vector<2x128xf32>
    %297 = arith.addf %296, %295 : vector<2x128xf32>
    %298 = arith.divf %296, %297 : vector<2x128xf32>
    %299 = math.tanh %293 : vector<2x128xf32>
    %300 = vector.extract_strided_slice %298 {offsets = [0, 0], sizes = [2, 32], strides = [1, 1]} : vector<2x128xf32> to vector<2x32xf32>
    %301 = vector.extract_strided_slice %298 {offsets = [0, 32], sizes = [2, 32], strides = [1, 1]} : vector<2x128xf32> to vector<2x32xf32>
    %302 = vector.extract_strided_slice %299 {offsets = [0, 64], sizes = [2, 32], strides = [1, 1]} : vector<2x128xf32> to vector<2x32xf32>
    %303 = vector.extract_strided_slice %298 {offsets = [0, 96], sizes = [2, 32], strides = [1, 1]} : vector<2x128xf32> to vector<2x32xf32>
    %304 = arith.mulf %301, %287 : vector<2x32xf32>
    %305 = arith.mulf %300, %302 : vector<2x32xf32>
    %306 = arith.addf %304, %305 : vector<2x32xf32>
    %307 = math.tanh %306 : vector<2x32xf32>
    %308 = arith.mulf %303, %307 : vector<2x32xf32>
    %c8 = arith.constant 8 : index
    %c0_81 = arith.constant 0 : index
    %309 = vector.load %arg22[%c8, %c0_81] : memref<16x32xf32, #tpu.memory_space<vmem>>, vector<2x32xf32>
    tpu.vector_store %arg22[%c8, %c0_81], %308 {strides = array<i32>} : memref<16x32xf32, #tpu.memory_space<vmem>>, vector<2x32xf32>,
    %310 = vector.extract_strided_slice %25 {offsets = [10, 0], sizes = [2, 128], strides = [1, 1]} : vector<16x128xf32> to vector<2x128xf32>
    %cst_82 = arith.constant dense<0.000000e+00> : vector<2x128xf32>
    %311 = tpu.matmul %308, %213, %cst_82 {dimension_numbers = #tpu.dot_dimension_numbers<[1], [0], [0], [1], [0, 0, 1, 1], [], []>} : vector<2x32xf32>, vector<32x128xf32>, vector<2x128xf32> -> vector<2x128xf32>
    %312 = arith.addf %310, %311 : vector<2x128xf32>
    %313 = arith.negf %312 : vector<2x128xf32>
    %314 = math.exp %313 : vector<2x128xf32>
    %cst_83 = arith.constant 1.000000e+00 : f32
    %315 = vector.broadcast %cst_83 : f32 to vector<2x128xf32>
    %316 = arith.addf %315, %314 : vector<2x128xf32>
    %317 = arith.divf %315, %316 : vector<2x128xf32>
    %318 = math.tanh %312 : vector<2x128xf32>
    %319 = vector.extract_strided_slice %317 {offsets = [0, 0], sizes = [2, 32], strides = [1, 1]} : vector<2x128xf32> to vector<2x32xf32>
    %320 = vector.extract_strided_slice %317 {offsets = [0, 32], sizes = [2, 32], strides = [1, 1]} : vector<2x128xf32> to vector<2x32xf32>
    %321 = vector.extract_strided_slice %318 {offsets = [0, 64], sizes = [2, 32], strides = [1, 1]} : vector<2x128xf32> to vector<2x32xf32>
    %322 = vector.extract_strided_slice %317 {offsets = [0, 96], sizes = [2, 32], strides = [1, 1]} : vector<2x128xf32> to vector<2x32xf32>
    %323 = arith.mulf %320, %306 : vector<2x32xf32>
    %324 = arith.mulf %319, %321 : vector<2x32xf32>
    %325 = arith.addf %323, %324 : vector<2x32xf32>
    %326 = math.tanh %325 : vector<2x32xf32>
    %327 = arith.mulf %322, %326 : vector<2x32xf32>
    %c10 = arith.constant 10 : index
    %c0_84 = arith.constant 0 : index
    %328 = vector.load %arg22[%c10, %c0_84] : memref<16x32xf32, #tpu.memory_space<vmem>>, vector<2x32xf32>
    tpu.vector_store %arg22[%c10, %c0_84], %327 {strides = array<i32>} : memref<16x32xf32, #tpu.memory_space<vmem>>, vector<2x32xf32>,
    %329 = vector.extract_strided_slice %25 {offsets = [12, 0], sizes = [2, 128], strides = [1, 1]} : vector<16x128xf32> to vector<2x128xf32>
    %cst_85 = arith.constant dense<0.000000e+00> : vector<2x128xf32>
    %330 = tpu.matmul %327, %213, %cst_85 {dimension_numbers = #tpu.dot_dimension_numbers<[1], [0], [0], [1], [0, 0, 1, 1], [], []>} : vector<2x32xf32>, vector<32x128xf32>, vector<2x128xf32> -> vector<2x128xf32>
    %331 = arith.addf %329, %330 : vector<2x128xf32>
    %332 = arith.negf %331 : vector<2x128xf32>
    %333 = math.exp %332 : vector<2x128xf32>
    %cst_86 = arith.constant 1.000000e+00 : f32
    %334 = vector.broadcast %cst_86 : f32 to vector<2x128xf32>
    %335 = arith.addf %334, %333 : vector<2x128xf32>
    %336 = arith.divf %334, %335 : vector<2x128xf32>
    %337 = math.tanh %331 : vector<2x128xf32>
    %338 = vector.extract_strided_slice %336 {offsets = [0, 0], sizes = [2, 32], strides = [1, 1]} : vector<2x128xf32> to vector<2x32xf32>
    %339 = vector.extract_strided_slice %336 {offsets = [0, 32], sizes = [2, 32], strides = [1, 1]} : vector<2x128xf32> to vector<2x32xf32>
    %340 = vector.extract_strided_slice %337 {offsets = [0, 64], sizes = [2, 32], strides = [1, 1]} : vector<2x128xf32> to vector<2x32xf32>
    %341 = vector.extract_strided_slice %336 {offsets = [0, 96], sizes = [2, 32], strides = [1, 1]} : vector<2x128xf32> to vector<2x32xf32>
    %342 = arith.mulf %339, %325 : vector<2x32xf32>
    %343 = arith.mulf %338, %340 : vector<2x32xf32>
    %344 = arith.addf %342, %343 : vector<2x32xf32>
    %345 = math.tanh %344 : vector<2x32xf32>
    %346 = arith.mulf %341, %345 : vector<2x32xf32>
    %c12 = arith.constant 12 : index
    %c0_87 = arith.constant 0 : index
    %347 = vector.load %arg22[%c12, %c0_87] : memref<16x32xf32, #tpu.memory_space<vmem>>, vector<2x32xf32>
    tpu.vector_store %arg22[%c12, %c0_87], %346 {strides = array<i32>} : memref<16x32xf32, #tpu.memory_space<vmem>>, vector<2x32xf32>,
    %348 = vector.extract_strided_slice %25 {offsets = [14, 0], sizes = [2, 128], strides = [1, 1]} : vector<16x128xf32> to vector<2x128xf32>
    %cst_88 = arith.constant dense<0.000000e+00> : vector<2x128xf32>
    %349 = tpu.matmul %346, %213, %cst_88 {dimension_numbers = #tpu.dot_dimension_numbers<[1], [0], [0], [1], [0, 0, 1, 1], [], []>} : vector<2x32xf32>, vector<32x128xf32>, vector<2x128xf32> -> vector<2x128xf32>
    %350 = arith.addf %348, %349 : vector<2x128xf32>
    %351 = arith.negf %350 : vector<2x128xf32>
    %352 = math.exp %351 : vector<2x128xf32>
    %cst_89 = arith.constant 1.000000e+00 : f32
    %353 = vector.broadcast %cst_89 : f32 to vector<2x128xf32>
    %354 = arith.addf %353, %352 : vector<2x128xf32>
    %355 = arith.divf %353, %354 : vector<2x128xf32>
    %356 = math.tanh %350 : vector<2x128xf32>
    %357 = vector.extract_strided_slice %355 {offsets = [0, 0], sizes = [2, 32], strides = [1, 1]} : vector<2x128xf32> to vector<2x32xf32>
    %358 = vector.extract_strided_slice %355 {offsets = [0, 32], sizes = [2, 32], strides = [1, 1]} : vector<2x128xf32> to vector<2x32xf32>
    %359 = vector.extract_strided_slice %356 {offsets = [0, 64], sizes = [2, 32], strides = [1, 1]} : vector<2x128xf32> to vector<2x32xf32>
    %360 = vector.extract_strided_slice %355 {offsets = [0, 96], sizes = [2, 32], strides = [1, 1]} : vector<2x128xf32> to vector<2x32xf32>
    %361 = arith.mulf %358, %344 : vector<2x32xf32>
    %362 = arith.mulf %357, %359 : vector<2x32xf32>
    %363 = arith.addf %361, %362 : vector<2x32xf32>
    %364 = math.tanh %363 : vector<2x32xf32>
    %365 = arith.mulf %360, %364 : vector<2x32xf32>
    %c14 = arith.constant 14 : index
    %c0_90 = arith.constant 0 : index
    %366 = vector.load %arg22[%c14, %c0_90] : memref<16x32xf32, #tpu.memory_space<vmem>>, vector<2x32xf32>
    tpu.vector_store %arg22[%c14, %c0_90], %365 {strides = array<i32>} : memref<16x32xf32, #tpu.memory_space<vmem>>, vector<2x32xf32>,
    %c0_91 = arith.constant 0 : index
    %c0_92 = arith.constant 0 : index
    %367 = vector.load %arg22[%c0_91, %c0_92] : memref<16x32xf32, #tpu.memory_space<vmem>>, vector<16x32xf32>
    %c0_93 = arith.constant 0 : index
    %c0_94 = arith.constant 0 : index
    %368 = vector.load %arg15[%c0_93, %c0_94] : memref<32x128xf32, #tpu.memory_space<vmem>>, vector<32x128xf32>
    %cst_95 = arith.constant dense<0.000000e+00> : vector<16x128xf32>
    %369 = tpu.matmul %367, %368, %cst_95 {dimension_numbers = #tpu.dot_dimension_numbers<[1], [0], [0], [1], [0, 0, 1, 1], [], []>} : vector<16x32xf32>, vector<32x128xf32>, vector<16x128xf32> -> vector<16x128xf32>
    %c0_96 = arith.constant 0 : index
    %c0_97 = arith.constant 0 : index
    %370 = vector.load %arg16[%c0_96, %c0_97] : memref<1x128xf32, #tpu.memory_space<vmem>>, vector<1x128xf32>
    %371 = vector.broadcast %370 : vector<1x128xf32> to vector<16x128xf32>
    %372 = arith.addf %369, %371 : vector<16x128xf32>
    %cst_98 = arith.constant dense<0xFF800000> : vector<16xf32>
    %373 = vector.multi_reduction <maximumf>, %372, %cst_98 [1] : vector<16x128xf32> to vector<16xf32>
    %374 = vector.shape_cast %373 : vector<16xf32> to vector<16x1xf32>
    %375 = vector.broadcast %374 : vector<16x1xf32> to vector<16x128xf32>
    %376 = arith.subf %372, %375 : vector<16x128xf32>
    %377 = math.exp %376 : vector<16x128xf32>
    %cst_99 = arith.constant dense<0.000000e+00> : vector<16xf32>
    %378 = vector.multi_reduction <add>, %377, %cst_99 [1] : vector<16x128xf32> to vector<16xf32>
    %379 = vector.shape_cast %378 : vector<16xf32> to vector<16x1xf32>
    %380 = math.log %379 : vector<16x1xf32>
    %381 = vector.broadcast %380 : vector<16x1xf32> to vector<16x128xf32>
    %382 = arith.subf %376, %381 : vector<16x128xf32>
    %c0_100 = arith.constant 0 : index
    %c0_101 = arith.constant 0 : index
    %383 = vector.load %arg19[%c0_100, %c0_101] : memref<16x128xf32, #tpu.memory_space<vmem>>, vector<16x128xf32>
    tpu.vector_store %arg19[%c0_100, %c0_101], %382 {strides = array<i32>} : memref<16x128xf32, #tpu.memory_space<vmem>>, vector<16x128xf32>,
    return
  }
}

</mosaic_0001>

<bundles_post_ra>
// kernel: sequence_vae_forward.1
= control target key start
LH: loop header
LB: loop body
LE: loop exit
PB: predicated region body
PF: predicated region fallthrough
CT: control target
= control target key end

     0   :  { %s4278_s0 = inlined_call_operand.vmem [shape: s32[16,1], index: 0, kind: input, shape index: {}]   ;;  %s4279_s1 = inlined_call_operand.vmem [shape: s32[16,1], index: 1, kind: input, shape index: {}]   ;;  %s4280_s2 = inlined_call_operand.vmem [shape: f32[32,32], index: 2, kind: input, shape index: {}]   ;;  %s4281_s3 = inlined_call_operand.vmem [shape: f32[32,128], index: 3, kind: input, shape index: {}]   ;;  %s4282_s4 = inlined_call_operand.vmem [shape: f32[32,128], index: 4, kind: input, shape index: {}]   ;;  %s4283_s5 = inlined_call_operand.hbm [shape: f32[1,128], index: 5, kind: input, shape index: {}]   ;;  %s4284_s6 = inlined_call_operand.vmem [shape: f32[32,128], index: 6, kind: input, shape index: {}]   ;;  %s4285_s7 = inlined_call_operand.vmem [shape: f32[32,128], index: 7, kind: input, shape index: {}]   ;;  %s4286_s8 = inlined_call_operand.hbm [shape: f32[1,128], index: 8, kind: input, shape index: {}]   ;;  %s4287_s9 = inlined_call_operand.vmem [shape: f32[32,64], index: 9, kind: input, shape index: {}]   ;;  %s4288_s10 = inlined_call_operand.vmem [shape: f32[32,64], index: 10, kind: input, shape index: {}]   ;;  %s4289_s11 = inlined_call_operand.hbm [shape: f32[1,64], index: 11, kind: input, shape index: {}]   ;;  %s4290_s12 = inlined_call_operand.vmem [shape: f32[32,128], index: 12, kind: input, shape index: {}]   ;;  %s4291_s13 = inlined_call_operand.hbm [shape: f32[32,128], index: 13, kind: input, shape index: {}]   ;;  %s4292_s14 = inlined_call_operand.vmem [shape: f32[1,128], index: 14, kind: input, shape index: {}]   ;;  %s4293_s15 = inlined_call_operand.hbm [shape: f32[32,128], index: 15, kind: input, shape index: {}]   ;;  %s4294_s16 = inlined_call_operand.vmem [shape: f32[1,128], index: 16, kind: input, shape index: {}]   ;;  %s4295_s17 = inlined_call_operand.vmem [shape: f32[2,32], index: 17, kind: input, shape index: {}]   ;;  %s4296_s18 = inlined_call_operand.vmem [shape: f32[2,32], index: 18, kind: input, shape index: {}]   ;;  %s4297_s19 = inlined_call_operand.hbm [shape: f32[16,128], index: 19, kind: output, shape index: {0}]   ;;  %s4298_s20 = inlined_call_operand.hbm [shape: f32[2,32], index: 20, kind: output, shape index: {1}]   ;;  %s4299_s21 = inlined_call_operand.hbm [shape: f32[2,32], index: 21, kind: output, shape index: {2}]  }
   0x1   :  { %4306 = sst [smem:[#allocation21_spill]] %s4278_s0 }
   0x2   :  { %4307 = sst [smem:[#allocation22_spill]] %s4279_s1 }
   0x3   :  { %4308 = sst [smem:[#allocation23_spill]] %s4280_s2 }
   0x4   :  { %4309 = sst [smem:[#allocation24_spill]] %s4281_s3 }
   0x5   :  { %4310 = sst [smem:[#allocation25_spill]] %s4282_s4 }
   0x6   :  { %4311 = sst [smem:[#allocation26_spill]] %s4283_s5 }
   0x7   :  { %27 = vsyncpa [#allocation4], 0 }
   0x8   :  { %28 = vsyncpa [#allocation7], 0 }
   0x9   :  { %29 = vsyncpa [#allocation10], 0 }
   0xa   :  { %30 = vsyncpa [#allocation5], 0 }
   0xb   :  { %31 = vsyncpa [#allocation14], 0  ;;  %s3633_s24 = smov [#allocation6]   ;;  %s3634_s7 = smov [#allocation9]  }
   0xc   :  { %s62_s2 = sshll.u32 %s3633_s24, 4  ;;  %s87_s25 = sshll.u32 %s3634_s7, 4  ;;  %s63_s2 = int_to_ptr.vmem [resolvable:$true] %s62_s2  ;;  %s3760_s25 = int_to_ptr.vmem [resolvable:$true] %s87_s25 }
   0xd   :  { %s3447_s27 = scalar_lea.hbm %s4286_s8, 16 }
   0xe   :  { %p3448_p0 = scmp.ne.s32.totalorder %s4286_s8, %s3447_s27  ;;  %p3451_p1 = scmp.lt.u32.totalorder %s3447_s27, %s4286_s8 }
  0x10   :  { %p3453_p2 = pnand %p3451_p1, %p3448_p0 }
  0x12   :  { %3456 = shalt.err (!%p3453_p2)
}
  0x13   :  { %s3457_s5 = scalar_lea.vmem %s63_s2, 16  ;;  %s3461_s30 = scalar_lea.vmem %s63_s2, 32 }
  0x14   :  { %p3458_p3 = scmp.ne.s32.totalorder %s63_s2, %s3457_s5  ;;  %p3462_p4 = scmp.lt.s32.totalorder %s63_s2, %s63_s2 }
  0x15   :  { %p3463_p5 = scmp.lt.s32.totalorder %s3461_s30, %s3457_s5 }
  0x17   :  { %p3464_p6 = por %p3463_p5, %p3462_p4 }
  0x19   :  { %p3465_p7 = pnand %p3464_p6, %p3458_p3 }
  0x1b   :  { %3468 = shalt.err (!%p3465_p7)
}
  0x1c   :  { %65 = dma.hbm_to_vmem [thread:$0]  %s4286_s8, 16, %s63_s2, [#allocation7]  }
  0x1d   :  { %s3469_s7 = scalar_lea.hbm %s4291_s13, 512 }
  0x1e   :  { %p3470_p8 = scmp.ne.s32.totalorder %s4291_s13, %s3469_s7  ;;  %p3473_p9 = scmp.lt.u32.totalorder %s3469_s7, %s4291_s13 }
  0x20   :  { %p3475_p10 = pnand %p3473_p9, %p3470_p8 }
  0x22   :  { %3478 = shalt.err (!%p3475_p10)
}
  0x23   :  { %s3479_s29 = scalar_lea.vmem %s3760_s25, 512  ;;  %p3484_p12 = scmp.lt.s32.totalorder %s3760_s25, %s3760_s25 }
  0x24   :  { %p3480_p11 = scmp.ne.s32.totalorder %s3760_s25, %s3479_s29  ;;  %p3485_p13 = scmp.lt.s32.totalorder %s3479_s29, %s3479_s29 }
  0x26   :  { %p3486_p0 = por %p3485_p13, %p3484_p12 }
  0x28   :  { %p3487_p1 = pnand %p3486_p0, %p3480_p11 }
  0x2a   :  { %3490 = shalt.err (!%p3487_p1)
}
  0x2b   :  { %s3635_s8 = smov 128   ;;  %s3636_s2 = smov 8  }
  0x2c   :  { %93 = dma.hbm_to_vmem [thread:$0]  %s4291_s13, 512, %s3760_s25, [#allocation10], %s3635_s8, %s3635_s8, %s3636_s2  }
  0x2d   :  { %s3637_s5 = smov [#allocation3]   ;;  %s3638_s22 = smov [#allocation8]  }
  0x2e   :  { %s48_s30 = sshll.u32 %s3637_s5, 4  ;;  %s76_s23 = sshll.u32 %s3638_s22, 4  ;;  %s49_s30 = int_to_ptr.vmem [resolvable:$true] %s48_s30  ;;  %s77_s23 = int_to_ptr.vmem [resolvable:$true] %s76_s23 }
  0x2f   :  { %s4312_s7 = sld [smem:[#allocation26_spill]] }
  0x35   :  { %s3491_s26 = scalar_lea.hbm %s4312_s7, 16 }
  0x36   :  { %p3492_p2 = scmp.ne.s32.totalorder %s4312_s7, %s3491_s26  ;;  %p3495_p3 = scmp.lt.u32.totalorder %s3491_s26, %s4312_s7 }
  0x38   :  { %p3497_p4 = pnand %p3495_p3, %p3492_p2 }
  0x3a   :  { %3500 = shalt.err (!%p3497_p4)
}
  0x3b   :  { %s3501_s13 = scalar_lea.vmem %s49_s30, 16  ;;  %s3505_s25 = scalar_lea.vmem %s49_s30, 32 }
  0x3c   :  { %p3502_p5 = scmp.ne.s32.totalorder %s49_s30, %s3501_s13  ;;  %p3506_p6 = scmp.lt.s32.totalorder %s49_s30, %s49_s30 }
  0x3d   :  { %p3507_p7 = scmp.lt.s32.totalorder %s3505_s25, %s3501_s13 }
  0x3f   :  { %p3508_p8 = por %p3507_p7, %p3506_p6 }
  0x41   :  { %p3509_p9 = pnand %p3508_p8, %p3502_p5 }
  0x43   :  { %3512 = shalt.err (!%p3509_p9)
}
  0x44   :  { %51 = dma.hbm_to_vmem [thread:$0]  %s4312_s7, 16, %s49_s30, [#allocation4]  }
  0x45   :  { %s3513_s1 = scalar_lea.hbm %s4289_s11, 16 }
  0x46   :  { %p3514_p10 = scmp.ne.s32.totalorder %s4289_s11, %s3513_s1  ;;  %p3517_p11 = scmp.lt.u32.totalorder %s3513_s1, %s4289_s11 }
  0x48   :  { %p3519_p12 = pnand %p3517_p11, %p3514_p10 }
  0x4a   :  { %3522 = shalt.err (!%p3519_p12)
}
  0x4b   :  { %s3523_s28 = scalar_lea.vmem %s77_s23, 16  ;;  %s3527_s29 = scalar_lea.vmem %s77_s23, 32 }
  0x4c   :  { %p3524_p13 = scmp.ne.s32.totalorder %s77_s23, %s3523_s28  ;;  %p3528_p0 = scmp.lt.s32.totalorder %s77_s23, %s77_s23 }
  0x4d   :  { %p3529_p1 = scmp.lt.s32.totalorder %s3527_s29, %s3523_s28 }
  0x4f   :  { %p3530_p2 = por %p3529_p1, %p3528_p0 }
  0x51   :  { %p3531_p3 = pnand %p3530_p2, %p3524_p13 }
  0x53   :  { %3534 = shalt.err (!%p3531_p3)
}
  0x54   :  { %79 = dma.hbm_to_vmem [thread:$0]  %s4289_s11, 16, %s77_s23, [#allocation7]  }
  0x55   :  { %s3639_s13 = smov [#allocation11]   ;;  %s3535_s5 = scalar_lea.hbm %s4293_s15, 512 }
  0x56   :  { %s101_s25 = sshll.u32 %s3639_s13, 4  ;;  %p3536_p4 = scmp.ne.s32.totalorder %s4293_s15, %s3535_s5  ;;  %s102_s25 = int_to_ptr.vmem [resolvable:$true] %s101_s25 }
  0x57   :  { %p3539_p5 = scmp.lt.u32.totalorder %s3535_s5, %s4293_s15 }
  0x59   :  { %p3541_p6 = pnand %p3539_p5, %p3536_p4 }
  0x5b   :  { %3544 = shalt.err (!%p3541_p6)
}
  0x5c   :  { %s3545_s3 = scalar_lea.vmem %s102_s25, 512  ;;  %p3550_p8 = scmp.lt.s32.totalorder %s102_s25, %s102_s25 }
  0x5d   :  { %p3546_p7 = scmp.ne.s32.totalorder %s102_s25, %s3545_s3  ;;  %p3551_p9 = scmp.lt.s32.totalorder %s3545_s3, %s3545_s3 }
  0x5f   :  { %p3552_p10 = por %p3551_p9, %p3550_p8 }
  0x61   :  { %p3553_p11 = pnand %p3552_p10, %p3546_p7 }
  0x63   :  { %3556 = shalt.err (!%p3553_p11)
}
  0x64   :  { %107 = dma.hbm_to_vmem [thread:$0]  %s4293_s15, 512, %s102_s25, [#allocation10], %s3635_s8, %s3635_s8, %s3636_s2  }
  0x65   :  { %3623 = dma.done.wait [#allocation4], 16  }
  0x66   :  { %3624 = vsyncadd [#allocation4], 4294967280 }
  0x67   :  { %3625 = dma.done.wait [#allocation7], 32  }
  0x68   :  { %3626 = vsyncadd [#allocation7], 4294967264 }
  0x69   :  { %3627 = dma.done.wait [#allocation10], 1024  }
  0x6a   :  { %3628 = vsyncadd [#allocation10], 4294966272  ;;  %v3640_v0 = vmov 0   ;;  %s4313_s29 = sld [smem:[#allocation21_spill]]  ;;  %s4314_s13 = sld [smem:[#allocation23_spill]]  ;;  %v129_v12 = vlaneseq  ;;  %vm159_vm0 = vcmask 261120  }
  0x6b   :  { %3299 = vset.pattern.permute.xlu0 %v3640_v0  ;;  %3300 = vset.pattern.permute.xlu1 %v3640_v0  ;;  %s4315_s11 = sld [smem:[#allocation24_spill]]  ;;  %v3641_v15 = vmov 0.0   ;;  %v3642_v22 = vmov 0.0|0.0   ;;  %s4316_s15 = sld [smem:[#allocation25_spill]]  ;;  %vm3643_vm3 = vmmov 0   ;;  %v414_v55 = vld [vmem:[%s4290_s12] sm:$0xff] }
  0x6c   :  { %v3857_v13 = vand.u32 127, %v129_v12  ;;  %v2693_v33 = vld [vmem:[#allocation3] ss:$0 sm:$0xff]  ;;  %s3644_s28 = smov 64   ;;  %v415_v56 = vld [vmem:[%s4290_s12 + $0x8] sm:$0xff]  ;;  %v417_v60 = vld [vmem:[%s4290_s12 + $0x18] sm:$0xff] }
  0x6d   :  { %v416_v57 = vld [vmem:[%s4290_s12 + $0x10] sm:$0xff]  ;;  %v3152_v59 = vpack.c.bf16 %v415_v56, %v414_v55  ;;  %vm1637_vm6 = vcmask 254976   ;;  %vm1863_vm7 = vcmask 257026   ;;  %vm2087_vm8 = vcmask 261126  }
  0x6e   :  { %v3156_v62 = vpack.c.bf16 %v417_v60, %v416_v57  ;;  %vm1975_vm9 = vcmask 259076  }
  0x70   :  { %v131_v1 = vld [vmem:[%s4313_s29] sm:$0xff]  ;;  %v156_v3 = vld [vmem:[%s4314_s13 + $0x8] sm:$0xff]  ;;  %v157_v4 = vld [vmem:[%s4314_s13 + $0x10] sm:$0xff] }
  0x71   :  { %v155_v2 = vld [vmem:[%s4314_s13] sm:$0xff]  ;;  %134 = vperm.xlu0 %3299, %v131_v1   ;;  %v158_v5 = vld [vmem:[%s4314_s13 + $0x18] sm:$0xff]  ;;  %v132_v6 = vld [vmem:[%s4313_s29 + $0x8] sm:$0xff]  ;;  %s3645_s29 = smov 32  }
  0x72   :  { %v3128_v7 = vpack.c.bf16 %v156_v3, %v155_v2  ;;  %v3132_v8 = vpack.c.bf16 %v158_v5, %v157_v4  ;;  %v322_v9 = vld [vmem:[%s4315_s11] sm:$0xff]  ;;  %v323_v10 = vld [vmem:[%s4315_s11 + $0x8] sm:$0xff]  ;;  %v324_v17 = vld [vmem:[%s4315_s11 + $0x10] sm:$0xff] }
  0x73   :  { %v3144_v11 = vpack.c.bf16 %v323_v10, %v322_v9  ;;  %v325_v18 = vld [vmem:[%s4315_s11 + $0x18] sm:$0xff]  ;;  %v506_v23 = vld [vmem:[%s4316_s15] sm:$0xff]  ;;  %v507_v24 = vld [vmem:[%s4316_s15 + $0x8] sm:$0xff]  ;;  %s4317_s11 = sld [smem:[#allocation22_spill]] }
  0x74   :  { %3129 = vmatprep.subr.bf16.mxu0 %v3128_v7  ;;  %3137 = vmatprep.subr.bf16.mxu1 %v3128_v7  ;;  %v3148_v20 = vpack.c.bf16 %v325_v18, %v324_v17  ;;  %v3880_v26 = vpack.c.bf16 %v507_v24, %v506_v23  ;;  %v508_v28 = vld [vmem:[%s4316_s15 + $0x10] sm:$0xff]  ;;  %v509_v29 = vld [vmem:[%s4316_s15 + $0x18] sm:$0xff]  ;;  %v3951_v2 = vld [vmem:[%s4292_s14] ss:$0 sm:$0xff] }
  0x75   :  { %137 = vperm.xlu0 %3299, %v132_v6   ;;  %3131 = vmatpush3.bf16.msra.mxu0 %v3128_v7  ;;  %v3892_v30 = vpack.c.bf16 %v509_v29, %v508_v28 }
  0x76   :  { %3133 = vmatprep.subr.bf16.mxu0 %v3132_v8  ;;  %3139 = vmatpush3.bf16.msra.mxu1 %v3128_v7 }
  0x77   :  { %3141 = vmatprep.subr.bf16.mxu1 %v3132_v8 }
  0x79   :  { %3135 = vmatpush3.bf16.msra.mxu0 %v3132_v8  ;;  %v143_v31 = vld [vmem:[%s4317_s11] sm:$0xff]  ;;  %v144_v32 = vld [vmem:[%s4317_s11 + $0x8] sm:$0xff] }
  0x7a   :  { %3145 = vmatprep.subr.bf16.mxu0 %v3144_v11  ;;  %3143 = vmatpush3.bf16.msra.mxu1 %v3132_v8 }
  0x7b   :  { %146 = vperm.xlu1 %3300, %v143_v31   ;;  %3153 = vmatprep.subr.bf16.mxu1 %v3152_v59 }
  0x7f   :  { %149 = vperm.xlu1 %3300, %v144_v32  }
  0xf0   :  { %v135_v14 = vpop.permute.xlu0 %134 }
  0xf1   :  { %vm139_vm1 = vcmp.eq.s32.totalorder %v135_v14, %v3857_v13 }
  0xf2   :  { %v141_v16 = vsel %vm139_vm1, 1.0, %v3641_v15 }
  0xf3   :  { %2872 = vmatprep.mubr.msk.f32.mxu0 %vm159_vm0, %v141_v16 }
  0xf4   :  { %v138_v19 = vpop.permute.xlu0 %137 }
  0xf5   :  { %vm140_vm2 = vcmp.eq.s32.totalorder %v138_v19, %v3857_v13 }
  0xf6   :  { %v142_v21 = vsel %vm140_vm2, 1.0, %v3641_v15 }
  0xf7   :  { %2873 = vmatmul.mubr.msk.f32.vlgmr.msra.gmra.mrb[0].mxu0 %vm159_vm0, %v142_v21 }
  0xf8   :  { %3147 = vmatpush3.bf16.msra.mxu0 %v3144_v11 }
  0xf9   :  { %3149 = vmatprep.subr.bf16.mxu0 %v3148_v20 }
  0xfa   :  { %v147_v42 = vpop.permute.xlu1 %146 }
  0xfb   :  { %vm151_vm4 = vcmp.eq.s32.totalorder %v147_v42, %v3857_v13 }
  0xfc   :  { %3151 = vmatpush3.bf16.msra.mxu0 %v3148_v20  ;;  %v153_v43 = vsel %vm151_vm4, 1.0, %v3641_v15 }
  0xfd   :  { %3160 = vmatprep.subr.bf16.mxu0 %v3642_v22  ;;  %2883 = vmatprep.mubr.msk.f32.mxu1 %vm159_vm0, %v153_v43 }
  0xfe   :  { %v150_v44 = vpop.permute.xlu1 %149 }
  0xff   :  { %vm152_vm5 = vcmp.eq.s32.totalorder %v150_v44, %v3857_v13 }
 0x100   :  { %v154_v45 = vsel %vm152_vm5, 1.0, %v3641_v15 }
 0x101   :  { %2884 = vmatmul.mubr.msk.f32.vlgmr.msra.gmra.mrb[0].mxu1 %vm159_vm0, %v154_v45 }
 0x102   :  { %3155 = vmatpush3.bf16.msra.mxu1 %v3152_v59 }
 0x103   :  { %3157 = vmatprep.subr.bf16.mxu1 %v3156_v62 }
 0x106   :  { %3159 = vmatpush3.bf16.msra.mxu1 %v3156_v62 }
 0x107   :  { %3166 = vmatprep.subr.bf16.mxu1 %v3642_v22 }
 0x1ca   :  { %v3878_v25 = vpop.f32.mrb[0].mxu0 }
 0x1cb   :  { %v232_v27 = vpop.f32.mrb[1].mxu0 }
 0x1cc   :  { %2894 = vmatprep.mubr.msk.f32.mxu0 %vm159_vm0, %v232_v27 }
 0x1cd   :  { %2895 = vmatmul.mubr.msk.f32.vlgmr.msra.gmra.mrb[2].mxu0 %vm159_vm0, %v3878_v25 }
 0x1ce   :  { %3162 = vmatpush3.bf16.msra.mxu0 %v3880_v26  ;;  %2916 = vmatprep.mubr.msk.f32.mxu0 %vm3643_vm3, %v3641_v15 }
 0x1cf   :  { %3163 = vmatprep.subr.bf16.mxu0 %v3642_v22 }
 0x1d2   :  { %3165 = vmatpush3.bf16.msra.mxu0 %v3892_v30 }
 0x1d3   :  { %3172 = vmatprep.subr.bf16.mxu0 %v3642_v22 }
 0x1d4   :  { %v2885_v58 = vpop.f32.mrb[0].mxu1 }
 0x1d5   :  { %2917 = vmatmul.mubr.f32.vlgmr.msra.gmra.mrb[4].mxu0 %v3641_v15  ;;  %v313_v61 = vpop.f32.mrb[1].mxu1 }
 0x1d6   :  { %3174 = vmatpush3.bf16.msra.mxu0 %v3880_v26  ;;  %2938 = vmatprep.mubr.msk.f32.mxu0 %vm3643_vm3, %v3641_v15 }
 0x1d7   :  { %3175 = vmatprep.subr.bf16.mxu0 %v3642_v22  ;;  %2905 = vmatprep.mubr.msk.f32.mxu1 %vm159_vm0, %v313_v61 }
 0x1d8   :  { %2906 = vmatmul.mubr.msk.f32.vlgmr.msra.gmra.mrb[2].mxu1 %vm159_vm0, %v2885_v58 }
 0x1d9   :  { %3168 = vmatpush3.bf16.msra.mxu1 %v3880_v26  ;;  %2927 = vmatprep.mubr.msk.f32.mxu1 %vm3643_vm3, %v3641_v15 }
 0x1da   :  { %3177 = vmatpush3.bf16.msra.mxu0 %v3892_v30  ;;  %3169 = vmatprep.subr.bf16.mxu1 %v3642_v22 }
 0x1db   :  { %3184 = vmatprep.subr.bf16.mxu0 %v3642_v22 }
 0x1dd   :  { %3171 = vmatpush3.bf16.msra.mxu1 %v3892_v30 }
 0x1de   :  { %3178 = vmatprep.subr.bf16.mxu1 %v3642_v22 }
 0x2a0   :  { %v2896_v34 = vpop.f32.mrb[2].mxu0 }
 0x2a1   :  { %v3912_v35 = vadd.f32 %v2896_v34, %v2693_v33  ;;  %v405_v36 = vpop.f32.mrb[3].mxu0 }
 0x2a2   :  { %v3914_v37 = vadd.f32 %v2693_v33, %v405_v36 }
 0x2a8   :  { %v579_v38 = vpop.f32.mrb[4].mxu0 }
 0x2a9   :  { %v583_v39 = vadd.f32 %v579_v38, %v3914_v37  ;;  %v2918_v40 = vpop.f32.mrb[5].mxu0 }
 0x2ab   :  { %3301 = vtanh.f32 %v583_v39  ;;  %v2699_v46 = vmul.f32 -1.442695, %v583_v39  ;;  %v2907_v3 = vpop.f32.mrb[2].mxu1 }
 0x2ac   :  { %v3954_v4 = vadd.f32 %v2907_v3, %v3951_v2  ;;  %v3956_v5 = vpop.f32.mrb[3].mxu1 }
 0x2ad   :  { %3303 = vpow2.f32 %v2699_v46 }
 0x2b5   :  { %v3302_v41 = vpop.eup %3301 }
 0x2b6   :  { %593 = vrot.lane.b32.xlu0 %v3302_v41, %s3644_s28 }
 0x2b7   :  { %v3304_v47 = vpop.eup %3303 }
 0x2b8   :  { %v587_v48 = vadd.f32 1.0, %v3304_v47 }
 0x2ba   :  { %3305 = vrcp.f32 %v587_v48 }
 0x2c4   :  { %v3306_v49 = vpop.eup %3305 }
 0x2c5   :  { %v591_v52 = vmul.f32 0.0, %v3306_v49 }
 0x328   :  { %v594_v50 = vpop.permute.xlu0 %593 }
 0x329   :  { %v596_v51 = vmul.f32 %v3306_v49, %v594_v50 }
 0x32b   :  { %598 = vrot.lane.b32.xlu1 %v596_v51, %s3645_s29 }
 0x39d   :  { %v599_v53 = vpop.permute.xlu1 %598 }
 0x39e   :  { %v601_v54 = vadd.f32 %v599_v53, %v591_v52 }
 0x3a0   :  { %3307 = vtanh.f32 %v601_v54  ;;  %v695_v19 = vrot.slane %v601_v54, 6 }
 0x3aa   :  { %v3308_v63 = vpop.eup %3307 }
 0x3ab   :  { %604 = vrot.lane.b32.xlu0 %v3308_v63, %s3644_s28 }
 0x41d   :  { %v605_v0 = vpop.permute.xlu0 %604 }
 0x41e   :  { %v607_v1 = vmul.f32 %v3306_v49, %v605_v0 }
 0x420   :  { %609 = vrot.lane.b32.xlu1 %v607_v1, %s3645_s29 }
 0x492   :  { %v610_v6 = vpop.permute.xlu1 %609 }
 0x493   :  { %2928 = vmatmul.mubr.msk.f32.vlgmr.msra.gmra.mrb[4].mxu1 %vm159_vm0, %v610_v6 }
 0x494   :  { %3180 = vmatpush3.bf16.msra.mxu1 %v3880_v26  ;;  %2949 = vmatprep.mubr.msk.f32.mxu1 %vm3643_vm3, %v3641_v15 }
 0x495   :  { %3181 = vmatprep.subr.bf16.mxu1 %v3642_v22 }
 0x498   :  { %3183 = vmatpush3.bf16.msra.mxu1 %v3892_v30 }
 0x499   :  { %3190 = vmatprep.subr.bf16.mxu1 %v3642_v22 }
 0x566   :  { %v679_v7 = vpop.f32.mrb[4].mxu1 }
 0x567   :  { %v684_v8 = vrot.slane %v679_v7, 6  ;;  %v2929_v9 = vpop.f32.mrb[5].mxu1 }
 0x569   :  { %v686_v10 = vadd.f32 %v684_v8, %v3914_v37 }
 0x56b   :  { %3309 = vtanh.f32 %v686_v10  ;;  %v2701_v12 = vmul.f32 -1.442695, %v686_v10 }
 0x56d   :  { %3311 = vpow2.f32 %v2701_v12 }
 0x575   :  { %v3310_v11 = vpop.eup %3309 }
 0x576   :  { %699 = vrot.lane.b32.xlu0 %v3310_v11, %s3644_s28 }
 0x577   :  { %v3312_v13 = vpop.eup %3311 }
 0x578   :  { %v690_v14 = vadd.f32 1.0, %v3312_v13 }
 0x57a   :  { %3313 = vrcp.f32 %v690_v14 }
 0x584   :  { %v3314_v16 = vpop.eup %3313 }
 0x585   :  { %v697_v20 = vmul.f32 %v3314_v16, %v695_v19 }
 0x5e8   :  { %v700_v17 = vpop.permute.xlu0 %699 }
 0x5e9   :  { %v702_v18 = vmul.f32 %v3314_v16, %v700_v17 }
 0x5eb   :  { %704 = vrot.lane.b32.xlu1 %v702_v18, %s3645_s29 }
 0x65d   :  { %v705_v21 = vpop.permute.xlu1 %704 }
 0x65e   :  { %v707_v23 = vadd.f32 %v705_v21, %v697_v20 }
 0x660   :  { %3315 = vtanh.f32 %v707_v23  ;;  %v802_v45 = vrot.slane %v707_v23, 6 }
 0x66a   :  { %v3316_v24 = vpop.eup %3315 }
 0x66b   :  { %710 = vrot.lane.b32.xlu0 %v3316_v24, %s3644_s28 }
 0x6dd   :  { %v711_v27 = vpop.permute.xlu0 %710 }
 0x6de   :  { %v713_v28 = vmul.f32 %v3314_v16, %v711_v27 }
 0x6e0   :  { %v715_v29 = vrot.slane %v713_v28, 2 }
 0x6e2   :  { %716 = vrot.lane.b32.xlu1 %v715_v29, %s3645_s29 }
 0x754   :  { %v717_v31 = vpop.permute.xlu1 %716 }
 0x755   :  { %2939 = vmatmul.mubr.msk.f32.vlgmr.msra.gmra.mrb[6].mxu0 %vm159_vm0, %v717_v31 }
 0x756   :  { %3186 = vmatpush3.bf16.msra.mxu0 %v3880_v26  ;;  %2960 = vmatprep.mubr.msk.f32.mxu0 %vm3643_vm3, %v3641_v15 }
 0x757   :  { %3187 = vmatprep.subr.bf16.mxu0 %v3642_v22 }
 0x75a   :  { %3189 = vmatpush3.bf16.msra.mxu0 %v3892_v30 }
 0x75b   :  { %3196 = vmatprep.subr.bf16.mxu0 %v3642_v22 }
 0x828   :  { %v786_v32 = vpop.f32.mrb[6].mxu0 }
 0x829   :  { %v791_v33 = vrot.slane %v786_v32, 4  ;;  %v2940_v34 = vpop.f32.mrb[7].mxu0 }
 0x82b   :  { %v793_v36 = vadd.f32 %v791_v33, %v3914_v37 }
 0x82d   :  { %3317 = vtanh.f32 %v793_v36  ;;  %v2703_v39 = vmul.f32 -1.442695, %v793_v36 }
 0x82f   :  { %3319 = vpow2.f32 %v2703_v39 }
 0x837   :  { %v3318_v38 = vpop.eup %3317 }
 0x838   :  { %806 = vrot.lane.b32.xlu0 %v3318_v38, %s3644_s28 }
 0x839   :  { %v3320_v40 = vpop.eup %3319 }
 0x83a   :  { %v797_v41 = vadd.f32 1.0, %v3320_v40 }
 0x83c   :  { %3321 = vrcp.f32 %v797_v41 }
 0x846   :  { %v3322_v42 = vpop.eup %3321 }
 0x847   :  { %v804_v46 = vmul.f32 %v3322_v42, %v802_v45 }
 0x8aa   :  { %v807_v43 = vpop.permute.xlu0 %806 }
 0x8ab   :  { %v809_v44 = vmul.f32 %v3322_v42, %v807_v43 }
 0x8ad   :  { %811 = vrot.lane.b32.xlu1 %v809_v44, %s3645_s29 }
 0x91f   :  { %v812_v47 = vpop.permute.xlu1 %811 }
 0x920   :  { %v814_v48 = vadd.f32 %v812_v47, %v804_v46 }
 0x922   :  { %3323 = vtanh.f32 %v814_v48  ;;  %v909_v1 = vrot.slane %v814_v48, 6 }
 0x92c   :  { %v3324_v49 = vpop.eup %3323 }
 0x92d   :  { %817 = vrot.lane.b32.xlu0 %v3324_v49, %s3644_s28 }
 0x99f   :  { %v818_v50 = vpop.permute.xlu0 %817 }
 0x9a0   :  { %v820_v51 = vmul.f32 %v3322_v42, %v818_v50 }
 0x9a2   :  { %v822_v52 = vrot.slane %v820_v51, 4 }
 0x9a4   :  { %823 = vrot.lane.b32.xlu1 %v822_v52, %s3645_s29 }
 0xa16   :  { %v824_v53 = vpop.permute.xlu1 %823 }
 0xa17   :  { %2950 = vmatmul.mubr.msk.f32.vlgmr.msra.gmra.mrb[6].mxu1 %vm159_vm0, %v824_v53 }
 0xa18   :  { %3192 = vmatpush3.bf16.msra.mxu1 %v3880_v26  ;;  %2971 = vmatprep.mubr.msk.f32.mxu1 %vm3643_vm3, %v3641_v15 }
 0xa19   :  { %3193 = vmatprep.subr.bf16.mxu1 %v3642_v22 }
 0xa1c   :  { %3195 = vmatpush3.bf16.msra.mxu1 %v3892_v30 }
 0xa1d   :  { %3202 = vmatprep.subr.bf16.mxu1 %v3642_v22 }
 0xaea   :  { %v893_v54 = vpop.f32.mrb[6].mxu1 }
 0xaeb   :  { %v898_v55 = vrot.slane %v893_v54, 2  ;;  %v2951_v56 = vpop.f32.mrb[7].mxu1  ;;  %v1352_v54 = vld [vmem:[%s4284_s6] sm:$0xff] }
 0xaed   :  { %v900_v57 = vadd.f32 %v898_v55, %v3914_v37  ;;  %v1353_v55 = vld [vmem:[%s4284_s6 + $0x8] sm:$0xff] }
 0xaee   :  { %v3209_v56 = vpack.c.bf16 %v1353_v55, %v1352_v54  ;;  %v1466_v55 = vld [vmem:[%s4288_s10 + $0x10] sm:$0xff] }
 0xaef   :  { %3325 = vtanh.f32 %v900_v57  ;;  %v2705_v59 = vmul.f32 -1.442695, %v900_v57  ;;  %v1354_v57 = vld [vmem:[%s4284_s6 + $0x10] sm:$0xff] }
 0xaf1   :  { %3327 = vpow2.f32 %v2705_v59 }
 0xaf9   :  { %v3326_v58 = vpop.eup %3325 }
 0xafa   :  { %913 = vrot.lane.b32.xlu0 %v3326_v58, %s3644_s28  ;;  %v1355_v58 = vld [vmem:[%s4284_s6 + $0x18] sm:$0xff] }
 0xafb   :  { %v3328_v60 = vpop.eup %3327 }
 0xafc   :  { %v904_v61 = vadd.f32 1.0, %v3328_v60  ;;  %v3212_v60 = vpack.c.bf16 %v1355_v58, %v1354_v57 }
 0xafe   :  { %3329 = vrcp.f32 %v904_v61  ;;  %v1363_v61 = vrot.slane %v3878_v25, 6 }
 0xb08   :  { %v3330_v62 = vpop.eup %3329 }
 0xb09   :  { %v911_v3 = vmul.f32 %v3330_v62, %v909_v1 }
 0xb6c   :  { %v914_v63 = vpop.permute.xlu0 %913 }
 0xb6d   :  { %v916_v0 = vmul.f32 %v3330_v62, %v914_v63 }
 0xb6f   :  { %918 = vrot.lane.b32.xlu1 %v916_v0, %s3645_s29 }
 0xbe1   :  { %v919_v6 = vpop.permute.xlu1 %918 }
 0xbe2   :  { %v921_v7 = vadd.f32 %v919_v6, %v911_v3 }
 0xbe4   :  { %3331 = vtanh.f32 %v921_v7  ;;  %v1013_v24 = vrot.slane %v921_v7, 6 }
 0xbee   :  { %v3332_v37 = vpop.eup %3331 }
 0xbef   :  { %924 = vrot.lane.b32.xlu0 %v3332_v37, %s3644_s28 }
 0xc61   :  { %v925_v8 = vpop.permute.xlu0 %924 }
 0xc62   :  { %v927_v9 = vmul.f32 %v3330_v62, %v925_v8 }
 0xc64   :  { %v929_v10 = vrot.slane %v927_v9, 6 }
 0xc66   :  { %930 = vrot.lane.b32.xlu1 %v929_v10, %s3645_s29 }
 0xcd8   :  { %v931_v11 = vpop.permute.xlu1 %930 }
 0xcd9   :  { %2961 = vmatmul.mubr.msk.f32.vlgmr.msra.gmra.mrb[8].mxu0 %vm159_vm0, %v931_v11 }
 0xcda   :  { %3198 = vmatpush3.bf16.msra.mxu0 %v3880_v26  ;;  %2982 = vmatprep.mubr.msk.f32.mxu0 %vm3643_vm3, %v3641_v15 }
 0xcdb   :  { %3199 = vmatprep.subr.bf16.mxu0 %v3642_v22 }
 0xcde   :  { %3201 = vmatpush3.bf16.msra.mxu0 %v3892_v30 }
 0xcdf   :  { %3208 = vmatprep.subr.bf16.mxu0 %v3642_v22 }
 0xdac   :  { %v1000_v12 = vpop.f32.mrb[8].mxu0 }
 0xdad   :  { %v1004_v13 = vadd.f32 %v1000_v12, %v3912_v35  ;;  %v2962_v14 = vpop.f32.mrb[9].mxu0 }
 0xdaf   :  { %3333 = vtanh.f32 %v1004_v13  ;;  %v2707_v17 = vmul.f32 -1.442695, %v1004_v13 }
 0xdb1   :  { %3335 = vpow2.f32 %v2707_v17 }
 0xdb9   :  { %v3334_v16 = vpop.eup %3333 }
 0xdba   :  { %1017 = vrot.lane.b32.xlu0 %v3334_v16, %s3644_s28 }
 0xdbb   :  { %v3336_v18 = vpop.eup %3335 }
 0xdbc   :  { %v1008_v19 = vadd.f32 1.0, %v3336_v18  ;;  %v2714_v18 = vld [vmem:[#allocation6] ss:$0 sm:$0xff] }
 0xdbe   :  { %3337 = vrcp.f32 %v1008_v19 }
 0xdc8   :  { %v3338_v20 = vpop.eup %3337 }
 0xdc9   :  { %v1015_v27 = vmul.f32 %v3338_v20, %v1013_v24 }
 0xe2c   :  { %v1018_v21 = vpop.permute.xlu0 %1017 }
 0xe2d   :  { %v1020_v23 = vmul.f32 %v3338_v20, %v1018_v21 }
 0xe2f   :  { %1022 = vrot.lane.b32.xlu1 %v1020_v23, %s3645_s29 }
 0xea1   :  { %v1023_v28 = vpop.permute.xlu1 %1022 }
 0xea2   :  { %v1025_v29 = vadd.f32 %v1023_v28, %v1015_v27 }
 0xea4   :  { %3339 = vtanh.f32 %v1025_v29 }
 0xeae   :  { %v3340_v31 = vpop.eup %3339 }
 0xeaf   :  { %1028 = vrot.lane.b32.xlu0 %v3340_v31, %s3644_s28 }
 0xf21   :  { %v1029_v32 = vpop.permute.xlu0 %1028 }
 0xf22   :  { %v1031_v33 = vmul.f32 %v3338_v20, %v1029_v32 }
 0xf24   :  { %1033 = vrot.lane.b32.xlu1 %v1031_v33, %s3645_s29 }
 0xf96   :  { %v1034_v34 = vpop.permute.xlu1 %1033 }
 0xf97   :  { %2972 = vmatmul.mubr.msk.f32.vlgmr.msra.gmra.mrb[8].mxu1 %vm159_vm0, %v1034_v34 }
 0xf98   :  { %3204 = vmatpush3.bf16.msra.mxu1 %v3880_v26  ;;  %2993 = vmatprep.mubr.msk.f32.mxu1 %vm3643_vm3, %v3641_v15 }
 0xf99   :  { %3205 = vmatprep.subr.bf16.mxu1 %v3642_v22 }
 0xf9c   :  { %3207 = vmatpush3.bf16.msra.mxu1 %v3892_v30  ;;  %v1119_v30 = vrot.slane %v1025_v29, 6 }
 0xf9d   :  { %3214 = vmatprep.subr.bf16.mxu1 %v3642_v22 }
0x106a   :  { %v1103_v36 = vpop.f32.mrb[8].mxu1 }
0x106b   :  { %v1108_v38 = vrot.slane %v1103_v36, 6  ;;  %v2973_v39 = vpop.f32.mrb[9].mxu1 }
0x106d   :  { %v1110_v40 = vadd.f32 %v1108_v38, %v3912_v35 }
0x106f   :  { %3341 = vtanh.f32 %v1110_v40  ;;  %v2709_v42 = vmul.f32 -1.442695, %v1110_v40 }
0x1071   :  { %3343 = vpow2.f32 %v2709_v42 }
0x1079   :  { %v3342_v41 = vpop.eup %3341 }
0x107a   :  { %1123 = vrot.lane.b32.xlu0 %v3342_v41, %s3644_s28 }
0x107b   :  { %v3344_v26 = vpop.eup %3343 }
0x107c   :  { %v1114_v43 = vadd.f32 1.0, %v3344_v26 }
0x107e   :  { %3345 = vrcp.f32 %v1114_v43 }
0x1088   :  { %v3346_v44 = vpop.eup %3345 }
0x1089   :  { %v1121_v47 = vmul.f32 %v3346_v44, %v1119_v30 }
0x10ec   :  { %v1124_v45 = vpop.permute.xlu0 %1123 }
0x10ed   :  { %v1126_v46 = vmul.f32 %v3346_v44, %v1124_v45 }
0x10ef   :  { %1128 = vrot.lane.b32.xlu1 %v1126_v46, %s3645_s29 }
0x1161   :  { %v1129_v48 = vpop.permute.xlu1 %1128 }
0x1162   :  { %v1131_v49 = vadd.f32 %v1129_v48, %v1121_v47 }
0x1164   :  { %3347 = vtanh.f32 %v1131_v49  ;;  %v1226_v12 = vrot.slane %v1131_v49, 6 }
0x116e   :  { %v3348_v50 = vpop.eup %3347 }
0x116f   :  { %1134 = vrot.lane.b32.xlu0 %v3348_v50, %s3644_s28  ;;  %v1464_v50 = vld [vmem:[%s4288_s10] sm:$0xff] }
0x11e1   :  { %v1135_v51 = vpop.permute.xlu0 %1134 }
0x11e2   :  { %v1137_v52 = vmul.f32 %v3346_v44, %v1135_v51 }
0x11e4   :  { %v1139_v53 = vrot.slane %v1137_v52, 2 }
0x11e6   :  { %1140 = vrot.lane.b32.xlu1 %v1139_v53, %s3645_s29 }
0x1258   :  { %v1141_v59 = vpop.permute.xlu1 %1140 }
0x1259   :  { %2983 = vmatmul.mubr.msk.f32.vlgmr.msra.gmra.mrb[10].mxu0 %vm159_vm0, %v1141_v59  ;;  %v1460_v59 = vld [vmem:[%s4287_s9] sm:$0xff] }
0x125a   :  { %3210 = vmatpush3.bf16.msra.mxu0 %v3209_v56  ;;  %3004 = vmatprep.mubr.msk.f32.mxu0 %vm3643_vm3, %v3641_v15  ;;  %v1467_v56 = vld [vmem:[%s4288_s10 + $0x18] sm:$0xff] }
0x125b   :  { %3211 = vmatprep.subr.bf16.mxu0 %v3642_v22  ;;  %v3218_v58 = vpack.c.bf16 %v1467_v56, %v1466_v55 }
0x125e   :  { %3213 = vmatpush3.bf16.msra.mxu0 %v3212_v60  ;;  %v1461_v60 = vld [vmem:[%s4287_s9 + $0x8] sm:$0xff] }
0x125f   :  { %3220 = vmatprep.subr.bf16.mxu0 %v3642_v22 }
0x1261   :  { %3005 = vmatmul.mubr.msk.f32.vlgmr.msra.gmra.mrb[12].mxu0 %vm159_vm0, %v1363_v61  ;;  %v1462_v61 = vld [vmem:[%s4287_s9 + $0x10] sm:$0xff] }
0x1262   :  { %3026 = vmatprep.mubr.msk.f32.mxu0 %vm3643_vm3, %v3641_v15 }
0x132c   :  { %v1210_v62 = vpop.f32.mrb[10].mxu0 }
0x132d   :  { %v1215_v63 = vrot.slane %v1210_v62, 4  ;;  %v2984_v0 = vpop.f32.mrb[11].mxu0  ;;  %v3221_v62 = vpack.c.bf16 %v1461_v60, %v1460_v59 }
0x132f   :  { %v1217_v1 = vadd.f32 %v1215_v63, %v3912_v35  ;;  %v1463_v63 = vld [vmem:[%s4287_s9 + $0x18] sm:$0xff]  ;;  %3222 = vmatpush3.bf16.msra.mxu0 %v3221_v62  ;;  %s3646_s9 = smov 96  }
0x1330   :  { %v3224_v0 = vpack.c.bf16 %v1463_v63, %v1462_v61  ;;  %3223 = vmatprep.subr.bf16.mxu0 %v3642_v22 }
0x1331   :  { %3349 = vtanh.f32 %v1217_v1  ;;  %v2711_v37 = vmul.f32 -1.442695, %v1217_v1 }
0x1333   :  { %3351 = vpow2.f32 %v2711_v37  ;;  %3225 = vmatpush3.bf16.msra.mxu0 %v3224_v0 }
0x1334   :  { %v1432_v3 = vpop.f32.mrb[12].mxu0  ;;  %3232 = vmatprep.subr.bf16.mxu0 %v3642_v22 }
0x1335   :  { %v3006_v6 = vpop.f32.mrb[13].mxu0  ;;  %v1433_v19 = vadd.f32 %v2714_v18, %v1432_v3 }
0x1337   :  { %v2716_v27 = vmul.f32 -1.442695, %v1433_v19 }
0x133b   :  { %v3350_v7 = vpop.eup %3349 }
0x133c   :  { %1230 = vrot.lane.b32.xlu0 %v3350_v7, %s3644_s28 }
0x133d   :  { %v3352_v25 = vpop.eup %3351 }
0x133e   :  { %v1221_v8 = vadd.f32 1.0, %v3352_v25 }
0x1340   :  { %3353 = vrcp.f32 %v1221_v8 }
0x134a   :  { %v3354_v9 = vpop.eup %3353 }
0x134b   :  { %v1228_v13 = vmul.f32 %v3354_v9, %v1226_v12  ;;  %v1644_v12 = vld [vmem:[#allocation9] sm:$0xff] }
0x13ae   :  { %v1231_v10 = vpop.permute.xlu0 %1230 }
0x13af   :  { %v1233_v11 = vmul.f32 %v3354_v9, %v1231_v10 }
0x13b1   :  { %1235 = vrot.lane.b32.xlu1 %v1233_v11, %s3645_s29 }
0x1423   :  { %v1236_v14 = vpop.permute.xlu1 %1235 }
0x1424   :  { %v1238_v16 = vadd.f32 %v1236_v14, %v1228_v13  ;;  %v1645_v13 = vld [vmem:[#allocation9 + $0x8] sm:$0xff] }
0x1425   :  { %v4090_v14 = vpack.c.bf16 %v1645_v13, %v1644_v12 }
0x1426   :  { %3355 = vtanh.f32 %v1238_v16  ;;  %v1333_v52 = vrot.slane %v1238_v16, 6 }
0x1427   :  { %3357 = vtanh.f32 %v1433_v19 }
0x1428   :  { %3359 = vpow2.f32 %v2716_v27 }
0x1430   :  { %v3356_v17 = vpop.eup %3355 }
0x1431   :  { %1241 = vrot.lane.b32.xlu0 %v3356_v17, %s3644_s28  ;;  %v3358_v24 = vpop.eup %3357  ;;  %v2719_v17 = vld [vmem:[#allocation8] ss:$0 sm:$0xff] }
0x1432   :  { %v3360_v28 = vpop.eup %3359 }
0x1433   :  { %v1439_v29 = vadd.f32 1.0, %v3360_v28 }
0x1435   :  { %3361 = vrcp.f32 %v1439_v29 }
0x143f   :  { %v3362_v32 = vpop.eup %3361 }
0x1440   :  { %v1443_v36 = vmul.f32 0.0, %v3362_v32 }
0x14a3   :  { %v1242_v20 = vpop.permute.xlu0 %1241 }
0x14a4   :  { %v1244_v21 = vmul.f32 %v3354_v9, %v1242_v20 }
0x14a6   :  { %v1246_v23 = vrot.slane %v1244_v21, 4 }
0x14a8   :  { %1247 = vrot.lane.b32.xlu1 %v1246_v23, %s3645_s29  ;;  %v1646_v23 = vld [vmem:[#allocation9 + $0x10] sm:$0xff] }
0x14ac   :  { %1445 = vrot.lane.b32.xlu1 %v3358_v24, %s3644_s28  ;;  %v1647_v24 = vld [vmem:[#allocation9 + $0x18] sm:$0xff] }
0x14ad   :  { %v4101_v28 = vpack.c.bf16 %v1647_v24, %v1646_v23 }
0x151a   :  { %v1248_v31 = vpop.permute.xlu1 %1247 }
0x151b   :  { %2994 = vmatmul.mubr.msk.f32.vlgmr.msra.gmra.mrb[10].mxu1 %vm159_vm0, %v1248_v31  ;;  %v1648_v31 = vld [vmem:[%s4296_s18] sm:$0x3] }
0x151c   :  { %3015 = vmatprep.mubr.msk.f32.mxu1 %vm3643_vm3, %v3641_v15 }
0x151e   :  { %v1446_v33 = vpop.permute.xlu1 %1445 }
0x151f   :  { %v1448_v34 = vmul.f32 %v3362_v32, %v1446_v33 }
0x1521   :  { %1450 = vrot.lane.b32.xlu1 %v1448_v34, %s3645_s29 }
0x1593   :  { %v1451_v38 = vpop.permute.xlu1 %1450 }
0x1594   :  { %v1453_v39 = vadd.f32 %v1451_v38, %v1443_v36  ;;  %v4125_v38 = vadd.f32 %v3951_v2, %v3956_v5 }
0x1596   :  { %3363 = vtanh.f32 %v1453_v39 }
0x15a0   :  { %v3364_v40 = vpop.eup %3363 }
0x15a1   :  { %1456 = vrot.lane.b32.xlu1 %v3364_v40, %s3644_s28 }
0x15ee   :  { %v1317_v41 = vpop.f32.mrb[10].mxu1 }
0x15ef   :  { %v1322_v42 = vrot.slane %v1317_v41, 2  ;;  %v2995_v26 = vpop.f32.mrb[11].mxu1 }
0x15f1   :  { %v1324_v43 = vadd.f32 %v1322_v42, %v3912_v35  ;;  %v1465_v35 = vld [vmem:[%s4288_s10 + $0x8] sm:$0xff] }
0x15f2   :  { %v3215_v51 = vpack.c.bf16 %v1465_v35, %v1464_v50 }
0x15f3   :  { %3365 = vtanh.f32 %v1324_v43  ;;  %v2713_v45 = vmul.f32 -1.442695, %v1324_v43 }
0x15f4   :  { %3216 = vmatpush3.bf16.msra.mxu1 %v3215_v51 }
0x15f5   :  { %3367 = vpow2.f32 %v2713_v45  ;;  %3217 = vmatprep.subr.bf16.mxu1 %v3642_v22 }
0x15f8   :  { %3219 = vmatpush3.bf16.msra.mxu1 %v3218_v58 }
0x15f9   :  { %3226 = vmatprep.subr.bf16.mxu1 %v3642_v22 }
0x15fd   :  { %v3366_v44 = vpop.eup %3365 }
0x15fe   :  { %1337 = vrot.lane.b32.xlu0 %v3366_v44, %s3644_s28 }
0x15ff   :  { %v3368_v46 = vpop.eup %3367 }
0x1600   :  { %v1328_v30 = vadd.f32 1.0, %v3368_v46 }
0x1602   :  { %3369 = vrcp.f32 %v1328_v30 }
0x160c   :  { %v3370_v47 = vpop.eup %3369 }
0x160d   :  { %v1335_v53 = vmul.f32 %v3370_v47, %v1333_v52 }
0x1613   :  { %v1457_v3 = vpop.permute.xlu1 %1456 }
0x1614   :  { %v1459_v6 = vmul.f32 %v3362_v32, %v1457_v3  ;;  %v1627_v32 = vld [vmem:[%s4295_s17] sm:$0x3] }
0x1670   :  { %v1338_v48 = vpop.permute.xlu0 %1337 }
0x1671   :  { %v1340_v49 = vmul.f32 %v3370_v47, %v1338_v48 }
0x1673   :  { %1342 = vrot.lane.b32.xlu0 %v1340_v49, %s3645_s29 }
0x16e5   :  { %v1343_v54 = vpop.permute.xlu0 %1342 }
0x16e6   :  { %v1345_v57 = vadd.f32 %v1343_v54, %v1335_v53 }
0x16e8   :  { %3371 = vtanh.f32 %v1345_v57 }
0x16f2   :  { %v3372_v1 = vpop.eup %3371 }
0x16f3   :  { %1348 = vrot.lane.b32.xlu0 %v3372_v1, %s3644_s28 }
0x16f7   :  { %1469 = vrot.lane.b32.xlu0 %v1459_v6, %s3645_s29 }
0x1765   :  { %v1349_v7 = vpop.permute.xlu0 %1348 }
0x1766   :  { %v1351_v37 = vmul.f32 %v3370_v47, %v1349_v7 }
0x1768   :  { %v1544_v25 = vrot.slane %v1351_v37, 6 }
0x1769   :  { %v1470_v8 = vpop.permute.xlu0 %1469 }
0x176a   :  { %1545 = vrot.lane.b32.xlu1 %v1544_v25, %s3645_s29  ;;  %3016 = vmatmul.mubr.msk.f32.vlgmr.msra.gmra.mrb[12].mxu1 %vm159_vm0, %v1470_v8 }
0x176b   :  { %3037 = vmatprep.mubr.msk.f32.mxu1 %vm3643_vm3, %v3641_v15  ;;  %3228 = vmatpush3.bf16.msra.mxu1 %v4090_v14 }
0x176c   :  { %3229 = vmatprep.subr.bf16.mxu1 %v3642_v22 }
0x176f   :  { %3231 = vmatpush3.bf16.msra.mxu1 %v4101_v28 }
0x1770   :  { %3238 = vmatprep.subr.bf16.mxu1 %v3642_v22 }
0x17dc   :  { %v1546_v9 = vpop.permute.xlu1 %1545 }
0x17dd   :  { %3027 = vmatmul.mubr.msk.f32.vlgmr.msra.gmra.mrb[14].mxu0 %vm159_vm0, %v1546_v9 }
0x17de   :  { %3048 = vmatprep.mubr.msk.f32.mxu0 %vm3643_vm3, %v3641_v15  ;;  %3234 = vmatpush3.bf16.msra.mxu0 %v4090_v14 }
0x17df   :  { %3235 = vmatprep.subr.bf16.mxu0 %v3642_v22 }
0x17e2   :  { %3237 = vmatpush3.bf16.msra.mxu0 %v4101_v28 }
0x17e3   :  { %3244 = vmatprep.subr.bf16.mxu0 %v3642_v22 }
0x183d   :  { %v1539_v10 = vpop.f32.mrb[12].mxu1 }
0x183e   :  { %v3017_v11 = vpop.f32.mrb[13].mxu1 }
0x18b0   :  { %v1615_v16 = vpop.f32.mrb[14].mxu0 }
0x18b1   :  { %v1616_v18 = vadd.f32 %v1615_v16, %v1539_v10  ;;  %v3028_v19 = vpop.f32.mrb[15].mxu0 }
0x18b3   :  { %v4096_v20 = vadd.f32 %v2719_v17, %v1616_v18 }
0x18b5   :  { %v1628_v21 = vmul.f32 0.5, %v4096_v20  ;;  %1638 = vst.msk [vmem:[#allocation13] sm:$0x3] %vm1637_vm6, %v4096_v20 }
0x18b7   :  { %v1629_v27 = vmul.f32 1.442695, %v1628_v21 }
0x18b9   :  { %3373 = vpow2.f32 %v1629_v27 }
0x18c3   :  { %v3374_v29 = vpop.eup %3373 }
0x18c4   :  { %1632 = vrot.lane.b32.xlu0 %v3374_v29, %s3646_s9 }
0x18c8   :  { %1731 = vrot.lane.b32.xlu0 %v1648_v31, %s3645_s29 }
0x1936   :  { %v1633_v33 = vpop.permute.xlu0 %1632 }
0x1937   :  { %v1635_v34 = vmul.f32 %v1633_v33, %v1627_v32 }
0x1939   :  { %v1636_v36 = vadd.f32 %v1635_v34, %v4096_v20 }
0x193a   :  { %v1732_v2 = vpop.permute.xlu0 %1731 }
0x193b   :  { %3038 = vmatmul.mubr.msk.f32.vlgmr.msra.gmra.mrb[14].mxu1 %vm159_vm0, %v1636_v36 }
0x193c   :  { %3240 = vmatpush3.bf16.msra.mxu1 %v4090_v14  ;;  %3059 = vmatprep.mubr.msk.f32.mxu1 %vm3643_vm3, %v3641_v15 }
0x193d   :  { %3241 = vmatprep.subr.bf16.mxu1 %v3642_v22 }
0x1940   :  { %3243 = vmatpush3.bf16.msra.mxu1 %v4101_v28 }
0x1941   :  { %3250 = vmatprep.subr.bf16.mxu1 %v3642_v22 }
0x1a0e   :  { %v1718_v39 = vpop.f32.mrb[14].mxu1 }
0x1a0f   :  { %v1722_v40 = vadd.f32 %v1718_v39, %v4125_v38  ;;  %v3039_v41 = vpop.f32.mrb[15].mxu1 }
0x1a11   :  { %3375 = vtanh.f32 %v1722_v40  ;;  %v2721_v26 = vmul.f32 -1.442695, %v1722_v40 }
0x1a13   :  { %3377 = vpow2.f32 %v2721_v26 }
0x1a1b   :  { %v3376_v42 = vpop.eup %3375 }
0x1a1c   :  { %1736 = vrot.lane.b32.xlu1 %v3376_v42, %s3644_s28 }
0x1a1d   :  { %v3378_v43 = vpop.eup %3377 }
0x1a1e   :  { %v1726_v44 = vadd.f32 1.0, %v3378_v43 }
0x1a20   :  { %3379 = vrcp.f32 %v1726_v44 }
0x1a2a   :  { %v3380_v45 = vpop.eup %3379 }
0x1a2b   :  { %v1734_v5 = vmul.f32 %v3380_v45, %v1732_v2 }
0x1a8e   :  { %v1737_v46 = vpop.permute.xlu1 %1736 }
0x1a8f   :  { %v1739_v30 = vmul.f32 %v3380_v45, %v1737_v46 }
0x1a91   :  { %1741 = vrot.lane.b32.xlu1 %v1739_v30, %s3645_s29 }
0x1b03   :  { %v1742_v47 = vpop.permute.xlu1 %1741 }
0x1b04   :  { %v1744_v48 = vadd.f32 %v1742_v47, %v1734_v5 }
0x1b06   :  { %3381 = vtanh.f32 %v1744_v48  ;;  %v1840_v63 = vrot.slane %v1744_v48, 6 }
0x1b10   :  { %v3382_v49 = vpop.eup %3381 }
0x1b11   :  { %1747 = vrot.lane.b32.xlu0 %v3382_v49, %s3644_s28 }
0x1b83   :  { %v1748_v50 = vpop.permute.xlu0 %1747 }
0x1b84   :  { %v1750_v35 = vmul.f32 %v3380_v45, %v1748_v50 }
0x1b86   :  { %1752 = vrot.lane.b32.xlu1 %v1750_v35, %s3645_s29 }
0x1bf8   :  { %v1753_v51 = vpop.permute.xlu1 %1752 }
0x1bf9   :  { %1755 = vst.msk [vmem:[#allocation2] sm:$0x3] %vm1637_vm6, %v1753_v51  ;;  %3049 = vmatmul.mubr.msk.f32.vlgmr.msra.gmra.mrb[16].mxu0 %vm159_vm0, %v1753_v51 }
0x1bfa   :  { %3246 = vmatpush3.bf16.msra.mxu0 %v4090_v14  ;;  %3070 = vmatprep.mubr.msk.f32.mxu0 %vm3643_vm3, %v3641_v15 }
0x1bfb   :  { %3247 = vmatprep.subr.bf16.mxu0 %v3642_v22 }
0x1bfe   :  { %3249 = vmatpush3.bf16.msra.mxu0 %v4101_v28 }
0x1bff   :  { %3256 = vmatprep.subr.bf16.mxu0 %v3642_v22 }
0x1ccc   :  { %v1824_v52 = vpop.f32.mrb[16].mxu0 }
0x1ccd   :  { %v1829_v53 = vrot.slane %v1824_v52, 6  ;;  %v3050_v54 = vpop.f32.mrb[17].mxu0 }
0x1ccf   :  { %v1831_v55 = vadd.f32 %v1829_v53, %v4125_v38 }
0x1cd1   :  { %3383 = vtanh.f32 %v1831_v55  ;;  %v2723_v57 = vmul.f32 -1.442695, %v1831_v55 }
0x1cd3   :  { %3385 = vpow2.f32 %v2723_v57 }
0x1cdb   :  { %v3384_v56 = vpop.eup %3383 }
0x1cdc   :  { %1844 = vrot.lane.b32.xlu0 %v3384_v56, %s3644_s28 }
0x1cdd   :  { %v3386_v58 = vpop.eup %3385 }
0x1cde   :  { %v1835_v59 = vadd.f32 1.0, %v3386_v58 }
0x1ce0   :  { %3387 = vrcp.f32 %v1835_v59 }
0x1cea   :  { %v3388_v60 = vpop.eup %3387 }
0x1ceb   :  { %v1842_v0 = vmul.f32 %v3388_v60, %v1840_v63 }
0x1d4e   :  { %v1845_v61 = vpop.permute.xlu0 %1844 }
0x1d4f   :  { %v1847_v62 = vmul.f32 %v3388_v60, %v1845_v61 }
0x1d51   :  { %1849 = vrot.lane.b32.xlu1 %v1847_v62, %s3645_s29 }
0x1dc3   :  { %v1850_v1 = vpop.permute.xlu1 %1849 }
0x1dc4   :  { %v1852_v3 = vadd.f32 %v1850_v1, %v1842_v0 }
0x1dc6   :  { %3389 = vtanh.f32 %v1852_v3  ;;  %v1952_v24 = vrot.slane %v1852_v3, 6 }
0x1dd0   :  { %v3390_v6 = vpop.eup %3389 }
0x1dd1   :  { %1855 = vrot.lane.b32.xlu0 %v3390_v6, %s3644_s28 }
0x1e43   :  { %v1856_v7 = vpop.permute.xlu0 %1855 }
0x1e44   :  { %v4144_v37 = vmul.f32 %v3388_v60, %v1856_v7 }
0x1e46   :  { %v1865_v25 = vrot.slane %v4144_v37, 2 }
0x1e48   :  { %1866 = vrot.lane.b32.xlu1 %v1865_v25, %s3645_s29 }
0x1eba   :  { %v1867_v8 = vpop.permute.xlu1 %1866 }
0x1ebb   :  { %3060 = vmatmul.mubr.msk.f32.vlgmr.msra.gmra.mrb[16].mxu1 %vm159_vm0, %v1867_v8 }
0x1ebc   :  { %3252 = vmatpush3.bf16.msra.mxu1 %v4090_v14  ;;  %3081 = vmatprep.mubr.msk.f32.mxu1 %vm3643_vm3, %v3641_v15 }
0x1ebd   :  { %3253 = vmatprep.subr.bf16.mxu1 %v3642_v22 }
0x1ec0   :  { %3255 = vmatpush3.bf16.msra.mxu1 %v4101_v28 }
0x1ec1   :  { %3262 = vmatprep.subr.bf16.mxu1 %v3642_v22 }
0x1f8e   :  { %v1936_v9 = vpop.f32.mrb[16].mxu1 }
0x1f8f   :  { %v1941_v10 = vrot.slane %v1936_v9, 4  ;;  %v3061_v11 = vpop.f32.mrb[17].mxu1 }
0x1f91   :  { %v1943_v12 = vadd.f32 %v1941_v10, %v4125_v38 }
0x1f93   :  { %3391 = vtanh.f32 %v1943_v12  ;;  %v2725_v16 = vmul.f32 -1.442695, %v1943_v12 }
0x1f95   :  { %3393 = vpow2.f32 %v2725_v16 }
0x1f9d   :  { %v3392_v13 = vpop.eup %3391 }
0x1f9e   :  { %1956 = vrot.lane.b32.xlu0 %v3392_v13, %s3644_s28 }
0x1f9f   :  { %v3394_v17 = vpop.eup %3393 }
0x1fa0   :  { %v1947_v18 = vadd.f32 1.0, %v3394_v17 }
0x1fa2   :  { %3395 = vrcp.f32 %v1947_v18 }
0x1fac   :  { %v3396_v19 = vpop.eup %3395 }
0x1fad   :  { %v1954_v27 = vmul.f32 %v3396_v19, %v1952_v24 }
0x2010   :  { %v1957_v21 = vpop.permute.xlu0 %1956 }
0x2011   :  { %v1959_v23 = vmul.f32 %v3396_v19, %v1957_v21 }
0x2013   :  { %1961 = vrot.lane.b32.xlu1 %v1959_v23, %s3645_s29 }
0x2085   :  { %v1962_v29 = vpop.permute.xlu1 %1961 }
0x2086   :  { %v1964_v31 = vadd.f32 %v1962_v29, %v1954_v27 }
0x2088   :  { %3397 = vtanh.f32 %v1964_v31  ;;  %v2064_v47 = vrot.slane %v1964_v31, 6 }
0x2092   :  { %v3398_v32 = vpop.eup %3397 }
0x2093   :  { %1967 = vrot.lane.b32.xlu0 %v3398_v32, %s3644_s28 }
0x2105   :  { %v1968_v33 = vpop.permute.xlu0 %1967 }
0x2106   :  { %v4159_v34 = vmul.f32 %v3396_v19, %v1968_v33 }
0x2108   :  { %v1977_v36 = vrot.slane %v4159_v34, 4 }
0x210a   :  { %1978 = vrot.lane.b32.xlu1 %v1977_v36, %s3645_s29 }
0x217c   :  { %v1979_v39 = vpop.permute.xlu1 %1978 }
0x217d   :  { %3071 = vmatmul.mubr.msk.f32.vlgmr.msra.gmra.mrb[18].mxu0 %vm159_vm0, %v1979_v39 }
0x217e   :  { %3258 = vmatpush3.bf16.msra.mxu0 %v4090_v14  ;;  %3092 = vmatprep.mubr.msk.f32.mxu0 %vm3643_vm3, %v3641_v15 }
0x217f   :  { %3259 = vmatprep.subr.bf16.mxu0 %v3642_v22 }
0x2182   :  { %3261 = vmatpush3.bf16.msra.mxu0 %v4101_v28 }
0x2183   :  { %3268 = vmatprep.subr.bf16.mxu0 %v3642_v22 }
0x2250   :  { %v2048_v40 = vpop.f32.mrb[18].mxu0 }
0x2251   :  { %v2053_v41 = vrot.slane %v2048_v40, 2  ;;  %v3072_v42 = vpop.f32.mrb[19].mxu0 }
0x2253   :  { %v2055_v26 = vadd.f32 %v2053_v41, %v4125_v38 }
0x2255   :  { %3399 = vtanh.f32 %v2055_v26  ;;  %v2727_v44 = vmul.f32 -1.442695, %v2055_v26 }
0x2257   :  { %3401 = vpow2.f32 %v2727_v44 }
0x225f   :  { %v3400_v43 = vpop.eup %3399 }
0x2260   :  { %2068 = vrot.lane.b32.xlu0 %v3400_v43, %s3644_s28 }
0x2261   :  { %v3402_v45 = vpop.eup %3401 }
0x2262   :  { %v2059_v46 = vadd.f32 1.0, %v3402_v45 }
0x2264   :  { %3403 = vrcp.f32 %v2059_v46 }
0x226e   :  { %v3404_v30 = vpop.eup %3403 }
0x226f   :  { %v2066_v48 = vmul.f32 %v3404_v30, %v2064_v47 }
0x22d2   :  { %v2069_v2 = vpop.permute.xlu0 %2068 }
0x22d3   :  { %v2071_v5 = vmul.f32 %v3404_v30, %v2069_v2 }
0x22d5   :  { %2073 = vrot.lane.b32.xlu1 %v2071_v5, %s3645_s29 }
0x2347   :  { %v2074_v49 = vpop.permute.xlu1 %2073 }
0x2348   :  { %v2076_v50 = vadd.f32 %v2074_v49, %v2066_v48 }
0x234a   :  { %3405 = vtanh.f32 %v2076_v50  ;;  %v2173_v0 = vrot.slane %v2076_v50, 6 }
0x2354   :  { %v3406_v38 = vpop.eup %3405 }
0x2355   :  { %2079 = vrot.lane.b32.xlu0 %v3406_v38, %s3644_s28 }
0x23c7   :  { %v2080_v35 = vpop.permute.xlu0 %2079 }
0x23c8   :  { %v4174_v51 = vmul.f32 %v3404_v30, %v2080_v35 }
0x23ca   :  { %v2089_v52 = vrot.slane %v4174_v51, 6 }
0x23cc   :  { %2090 = vrot.lane.b32.xlu1 %v2089_v52, %s3645_s29 }
0x243e   :  { %v2091_v53 = vpop.permute.xlu1 %2090 }
0x243f   :  { %3082 = vmatmul.mubr.msk.f32.vlgmr.msra.gmra.mrb[18].mxu1 %vm159_vm0, %v2091_v53 }
0x2440   :  { %3264 = vmatpush3.bf16.msra.mxu1 %v4090_v14  ;;  %3103 = vmatprep.mubr.msk.f32.mxu1 %vm3643_vm3, %v3641_v15 }
0x2441   :  { %3265 = vmatprep.subr.bf16.mxu1 %v3642_v22 }
0x2444   :  { %3267 = vmatpush3.bf16.msra.mxu1 %v4101_v28 }
0x2512   :  { %v2160_v54 = vpop.f32.mrb[18].mxu1 }
0x2513   :  { %v2164_v55 = vadd.f32 %v2160_v54, %v3954_v4  ;;  %v3083_v56 = vpop.f32.mrb[19].mxu1 }
0x2515   :  { %3407 = vtanh.f32 %v2164_v55  ;;  %v2729_v58 = vmul.f32 -1.442695, %v2164_v55 }
0x2517   :  { %3409 = vpow2.f32 %v2729_v58 }
0x251f   :  { %v3408_v57 = vpop.eup %3407 }
0x2520   :  { %2177 = vrot.lane.b32.xlu0 %v3408_v57, %s3644_s28 }
0x2521   :  { %v3410_v59 = vpop.eup %3409 }
0x2522   :  { %v2168_v60 = vadd.f32 1.0, %v3410_v59 }
0x2524   :  { %3411 = vrcp.f32 %v2168_v60 }
0x252e   :  { %v3412_v61 = vpop.eup %3411 }
0x252f   :  { %v2175_v1 = vmul.f32 %v3412_v61, %v2173_v0 }
0x2592   :  { %v2178_v62 = vpop.permute.xlu0 %2177 }
0x2593   :  { %v2180_v63 = vmul.f32 %v3412_v61, %v2178_v62 }
0x2595   :  { %2182 = vrot.lane.b32.xlu1 %v2180_v63, %s3645_s29 }
0x2607   :  { %v2183_v3 = vpop.permute.xlu1 %2182 }
0x2608   :  { %v2185_v6 = vadd.f32 %v2183_v3, %v2175_v1 }
0x260a   :  { %3413 = vtanh.f32 %v2185_v6 }
0x2614   :  { %v3414_v7 = vpop.eup %3413 }
0x2615   :  { %2188 = vrot.lane.b32.xlu0 %v3414_v7, %s3644_s28 }
0x2687   :  { %v2189_v25 = vpop.permute.xlu0 %2188 }
0x2688   :  { %v2191_v8 = vmul.f32 %v3412_v61, %v2189_v25 }
0x268a   :  { %2193 = vrot.lane.b32.xlu1 %v2191_v8, %s3645_s29  ;;  %v2530_v8 = vld [vmem:[#allocation11 + $0x8] sm:$0xff] }
0x26fc   :  { %v2194_v9 = vpop.permute.xlu1 %2193 }
0x26fd   :  { %2196 = vst.msk [vmem:[#allocation2 + $0x8] sm:$0x3] %vm1637_vm6, %v2194_v9  ;;  %3093 = vmatmul.mubr.msk.f32.vlgmr.msra.gmra.mrb[20].mxu0 %vm159_vm0, %v2194_v9 }
0x26fe   :  { %3270 = vmatpush3.bf16.msra.mxu0 %v4090_v14  ;;  %3114 = vmatprep.mubr.msk.f32.mxu0 %vm3643_vm3, %v3641_v15 }
0x26ff   :  { %3271 = vmatprep.subr.bf16.mxu0 %v3642_v22  ;;  %v2281_v22 = vrot.slane %v2185_v6, 6 }
0x2702   :  { %3273 = vmatpush3.bf16.msra.mxu0 %v4101_v28 }
0x27d0   :  { %v2265_v10 = vpop.f32.mrb[20].mxu0 }
0x27d1   :  { %v2270_v11 = vrot.slane %v2265_v10, 6  ;;  %v3094_v12 = vpop.f32.mrb[21].mxu0  ;;  %v2531_v10 = vld [vmem:[#allocation11 + $0x10] sm:$0xff] }
0x27d3   :  { %v2272_v13 = vadd.f32 %v2270_v11, %v3954_v4  ;;  %v2532_v11 = vld [vmem:[#allocation11 + $0x18] sm:$0xff] }
0x27d4   :  { %v3278_v12 = vpack.c.bf16 %v2532_v11, %v2531_v10 }
0x27d5   :  { %3415 = vtanh.f32 %v2272_v13  ;;  %v2731_v17 = vmul.f32 -1.442695, %v2272_v13 }
0x27d7   :  { %3417 = vpow2.f32 %v2731_v17 }
0x27df   :  { %v3416_v16 = vpop.eup %3415 }
0x27e0   :  { %2285 = vrot.lane.b32.xlu0 %v3416_v16, %s3644_s28 }
0x27e1   :  { %v3418_v18 = vpop.eup %3417 }
0x27e2   :  { %v2276_v14 = vadd.f32 1.0, %v3418_v18 }
0x27e4   :  { %3419 = vrcp.f32 %v2276_v14 }
0x27ee   :  { %v3420_v19 = vpop.eup %3419 }
0x27ef   :  { %v2283_v28 = vmul.f32 %v3420_v19, %v2281_v22 }
0x2852   :  { %v2286_v15 = vpop.permute.xlu0 %2285 }
0x2853   :  { %v2288_v21 = vmul.f32 %v3420_v19, %v2286_v15  ;;  %v2736_v15 = vld [vmem:[%s4294_s16] ss:$0 sm:$0xff]  ;;  %s3647_s16 = smov [#allocation13]  }
0x2855   :  { %2290 = vrot.lane.b32.xlu1 %v2288_v21, %s3645_s29 }
0x28c7   :  { %v2291_v23 = vpop.permute.xlu1 %2290 }
0x28c8   :  { %v2293_v24 = vadd.f32 %v2291_v23, %v2283_v28 }
0x28ca   :  { %3421 = vtanh.f32 %v2293_v24  ;;  %v2392_v2 = vrot.slane %v2293_v24, 6 }
0x28d4   :  { %v3422_v27 = vpop.eup %3421 }
0x28d5   :  { %2296 = vrot.lane.b32.xlu0 %v3422_v27, %s3644_s28 }
0x2947   :  { %v2297_v29 = vpop.permute.xlu0 %2296 }
0x2948   :  { %v4200_v31 = vmul.f32 %v3420_v19, %v2297_v29 }
0x294a   :  { %v2305_v32 = vrot.slane %v4200_v31, 2 }
0x294c   :  { %2306 = vrot.lane.b32.xlu1 %v2305_v32, %s3645_s29 }
0x29be   :  { %v2307_v33 = vpop.permute.xlu1 %2306 }
0x29bf   :  { %3104 = vmatmul.mubr.msk.f32.vlgmr.msra.gmra.mrb[20].mxu1 %vm159_vm0, %v2307_v33 }
0x2a92   :  { %v2376_v36 = vpop.f32.mrb[20].mxu1 }
0x2a93   :  { %v2381_v39 = vrot.slane %v2376_v36, 4  ;;  %v3105_v40 = vpop.f32.mrb[21].mxu1 }
0x2a95   :  { %v2383_v41 = vadd.f32 %v2381_v39, %v3954_v4 }
0x2a97   :  { %3423 = vtanh.f32 %v2383_v41  ;;  %v2733_v26 = vmul.f32 -1.442695, %v2383_v41 }
0x2a99   :  { %3425 = vpow2.f32 %v2733_v26 }
0x2aa1   :  { %v3424_v42 = vpop.eup %3423 }
0x2aa2   :  { %2396 = vrot.lane.b32.xlu0 %v3424_v42, %s3644_s28 }
0x2aa3   :  { %v3426_v43 = vpop.eup %3425 }
0x2aa4   :  { %v2387_v44 = vadd.f32 1.0, %v3426_v43 }
0x2aa6   :  { %3427 = vrcp.f32 %v2387_v44 }
0x2ab0   :  { %v3428_v45 = vpop.eup %3427 }
0x2ab1   :  { %v2394_v5 = vmul.f32 %v3428_v45, %v2392_v2 }
0x2b14   :  { %v2397_v46 = vpop.permute.xlu0 %2396 }
0x2b15   :  { %v2399_v30 = vmul.f32 %v3428_v45, %v2397_v46 }
0x2b17   :  { %2401 = vrot.lane.b32.xlu1 %v2399_v30, %s3645_s29 }
0x2b89   :  { %v2402_v47 = vpop.permute.xlu1 %2401 }
0x2b8a   :  { %v2404_v48 = vadd.f32 %v2402_v47, %v2394_v5 }
0x2b8c   :  { %3429 = vtanh.f32 %v2404_v48 }
0x2b96   :  { %v3430_v49 = vpop.eup %3429 }
0x2b97   :  { %2407 = vrot.lane.b32.xlu0 %v3430_v49, %s3644_s28 }
0x2c09   :  { %v2408_v50 = vpop.permute.xlu0 %2407 }
0x2c0a   :  { %v2410_v38 = vmul.f32 %v3428_v45, %v2408_v50 }
0x2c0c   :  { %v2416_v35 = vrot.slane %v2410_v38, 4 }
0x2c0e   :  { %2417 = vrot.lane.b32.xlu1 %v2416_v35, %s3645_s29 }
0x2c80   :  { %v2418_v52 = vpop.permute.xlu1 %2417 }
0x2c81   :  { %3115 = vmatmul.mubr.msk.f32.vlgmr.msra.gmra.mrb[22].mxu0 %vm159_vm0, %v2418_v52 }
0x2d54   :  { %v2487_v53 = vpop.f32.mrb[22].mxu0 }
0x2d55   :  { %v2492_v54 = vrot.slane %v2487_v53, 2  ;;  %v3116_v55 = vpop.f32.mrb[23].mxu0 }
0x2d57   :  { %v2494_v56 = vadd.f32 %v2492_v54, %v3954_v4  ;;  %v2503_v4 = vrot.slane %v2404_v48, 6 }
0x2d59   :  { %3431 = vtanh.f32 %v2494_v56  ;;  %v2735_v58 = vmul.f32 -1.442695, %v2494_v56 }
0x2d5b   :  { %3433 = vpow2.f32 %v2735_v58 }
0x2d63   :  { %v3432_v57 = vpop.eup %3431 }
0x2d64   :  { %2507 = vrot.lane.b32.xlu0 %v3432_v57, %s3644_s28 }
0x2d65   :  { %v3434_v59 = vpop.eup %3433 }
0x2d66   :  { %v2498_v60 = vadd.f32 1.0, %v3434_v59 }
0x2d68   :  { %3435 = vrcp.f32 %v2498_v60 }
0x2d72   :  { %v3436_v61 = vpop.eup %3435 }
0x2d73   :  { %v2505_v0 = vmul.f32 %v3436_v61, %v2503_v4 }
0x2dd6   :  { %v2508_v62 = vpop.permute.xlu0 %2507 }
0x2dd7   :  { %v2510_v63 = vmul.f32 %v3436_v61, %v2508_v62 }
0x2dd9   :  { %2512 = vrot.lane.b32.xlu1 %v2510_v63, %s3645_s29 }
0x2ddd   :  { %1860 = vrot.lane.b32.xlu1 %v4144_v37, %s3645_s29 }
0x2de1   :  { %2084 = vrot.lane.b32.xlu1 %v4174_v51, %s3645_s29  ;;  %v2529_v51 = vld [vmem:[#allocation11] sm:$0xff] }
0x2de2   :  { %v3274_v9 = vpack.c.bf16 %v2530_v8, %v2529_v51 }
0x2de4   :  { %3275 = vmatprep.subr.bf16.mxu1 %v3274_v9 }
0x2de5   :  { %2412 = vrot.lane.b32.xlu1 %v2410_v38, %s3645_s29  ;;  %3277 = vmatpush3.bf16.msra.mxu1 %v3274_v9 }
0x2de6   :  { %3279 = vmatprep.subr.bf16.mxu1 %v3278_v12 }
0x2de9   :  { %3281 = vmatpush3.bf16.msra.mxu1 %v3278_v12 }
0x2e4b   :  { %v2513_v1 = vpop.permute.xlu1 %2512 }
0x2e4c   :  { %v2515_v3 = vadd.f32 %v2513_v1, %v2505_v0 }
0x2e4e   :  { %3437 = vtanh.f32 %v2515_v3 }
0x2e4f   :  { %v1861_v6 = vpop.permute.xlu1 %1860 }
0x2e50   :  { %1864 = vst.msk [vmem:[#allocation2] sm:$0xc] %vm1863_vm7, %v1861_v6 }
0x2e53   :  { %v2085_v7 = vpop.permute.xlu1 %2084 }
0x2e54   :  { %2088 = vst.msk [vmem:[#allocation2] sm:$0xc0] %vm2087_vm8, %v2085_v7 }
0x2e57   :  { %v2413_v37 = vpop.permute.xlu1 %2412 }
0x2e58   :  { %v3438_v25 = vpop.eup %3437  ;;  %2415 = vst.msk [vmem:[#allocation2 + $0x8] sm:$0x30] %vm1975_vm9, %v2413_v37 }
0x2e59   :  { %2518 = vrot.lane.b32.xlu0 %v3438_v25, %s3644_s28  ;;  %s2661_s28 = sshll.u32 %s3647_s16, 4  ;;  %s2662_s28 = int_to_ptr.vmem [resolvable:$true] %s2661_s28 }
0x2e5a   :  { %p3562_p13 = scmp.lt.s32.totalorder %s2662_s28, %s2662_s28 }
0x2e5d   :  { %1972 = vrot.lane.b32.xlu0 %v4159_v34, %s3645_s29 }
0x2e61   :  { %2301 = vrot.lane.b32.xlu0 %v4200_v31, %s3645_s29 }
0x2ecb   :  { %v2519_v13 = vpop.permute.xlu0 %2518 }
0x2ecc   :  { %v2521_v16 = vmul.f32 %v3436_v61, %v2519_v13 }
0x2ece   :  { %2523 = vrot.lane.b32.xlu0 %v2521_v16, %s3645_s29  ;;  %s3557_s29 = scalar_lea.vmem %s2662_s28, 32 }
0x2ecf   :  { %v1973_v17 = vpop.permute.xlu0 %1972  ;;  %p3558_p12 = scmp.ne.s32.totalorder %s2662_s28, %s3557_s29  ;;  %p3563_p0 = scmp.lt.s32.totalorder %s3557_s29, %s3557_s29 }
0x2ed0   :  { %1976 = vst.msk [vmem:[#allocation2] sm:$0x30] %vm1975_vm9, %v1973_v17 }
0x2ed1   :  { %p3564_p1 = por %p3563_p0, %p3562_p13 }
0x2ed3   :  { %v2302_v34 = vpop.permute.xlu0 %2301  ;;  %p3565_p2 = pnand %p3564_p1, %p3558_p12 }
0x2ed4   :  { %2304 = vst.msk [vmem:[#allocation2 + $0x8] sm:$0xc] %vm1863_vm7, %v2302_v34 }
0x2ed7   :  { %v2527_v18 = vld [vmem:[#allocation2] sm:$0xff] }
0x2ed8   :  { %3125 = vmatprep.mubr.msk.f32.mxu1 %vm159_vm0, %v2527_v18 }
0x2f40   :  { %v2524_v14 = vpop.permute.xlu0 %2523 }
0x2f41   :  { %2526 = vst.msk [vmem:[#allocation2 + $0x8] sm:$0xc0] %vm2087_vm8, %v2524_v14 }
0x2f48   :  { %v2528_v19 = vld [vmem:[#allocation2 + $0x8] sm:$0xff] }
0x2f49   :  { %3126 = vmatmul.mubr.msk.f32.vlgmr.msra.gmra.mrb[22].mxu1 %vm159_vm0, %v2528_v19 }
0x301c   :  { %v3127_v21 = vpop.f32.mrb[22].mxu1 }
0x301d   :  { %v2618_v22 = vadd.f32 %v3127_v21, %v2736_v15  ;;  %v2612_v28 = vpop.f32.mrb[23].mxu1 }
0x301e   :  { %v2613_v23 = vadd.f32 %v2736_v15, %v2612_v28 }
0x301f   :  { %2623 = vmax.xlane.f32.xlu0 %v2618_v22 }
0x3020   :  { %2621 = vmax.xlane.f32.xlu1 %v2613_v23 }
0x30ac   :  { %v2624_v24 = vpop.xlane.xlu0 %2623 }
0x30ad   :  { %v2626_v27 = vsub.f32 %v2618_v22, %v2624_v24  ;;  %v2622_v29 = vpop.xlane.xlu1 %2621 }
0x30ae   :  { %v2625_v31 = vsub.f32 %v2613_v23, %v2622_v29 }
0x30af   :  { %v2629_v32 = vmul.f32 1.442695, %v2626_v27 }
0x30b0   :  { %v2627_v33 = vmul.f32 1.442695, %v2625_v31 }
0x30b1   :  { %3439 = vpow2.f32 %v2629_v32 }
0x30b2   :  { %3441 = vpow2.f32 %v2627_v33 }
0x30bb   :  { %v3440_v36 = vpop.eup %3439 }
0x30bc   :  { %v3442_v39 = vpop.eup %3441  ;;  %2633 = vadd.xlane.f32.xlu1 %v3440_v36 }
0x30bd   :  { %2631 = vadd.xlane.f32.xlu0 %v3442_v39 }
0x30d3   :  { %1640 = vrot.lane.b32.xlu0 %v4096_v20, %s3646_s9 }
0x30d4   :  { %3568 = shalt.err (!%p3565_p2)
}
0x30d5   :  { %s3569_s7 = scalar_lea.hbm %s4298_s20, 32 }
0x30d6   :  { %p3570_p3 = scmp.ne.s32.totalorder %s4298_s20, %s3569_s7  ;;  %p3573_p4 = scmp.lt.u32.totalorder %s3569_s7, %s4298_s20 }
0x30d8   :  { %p3575_p5 = pnand %p3573_p4, %p3570_p3 }
0x30da   :  { %3578 = shalt.err (!%p3575_p5)
}
0x30db   :  { %2664 = dma.vmem_to_hbm [thread:$0]  %s2662_s28, 32, %s4298_s20, [#allocation14]  }
0x30dc   :  { %s3648_s12 = smov [#allocation15]  }
0x30dd   :  { %s2671_s22 = sshll.u32 %s3648_s12, 4  ;;  %s2672_s22 = int_to_ptr.vmem [resolvable:$true] %s2671_s22 }
0x30de   :  { %s3579_s14 = scalar_lea.vmem %s2672_s22, 32  ;;  %p3584_p7 = scmp.lt.s32.totalorder %s2672_s22, %s2672_s22 }
0x30df   :  { %p3580_p6 = scmp.ne.s32.totalorder %s2672_s22, %s3579_s14  ;;  %p3585_p8 = scmp.lt.s32.totalorder %s3579_s14, %s3579_s14 }
0x30e1   :  { %p3586_p9 = por %p3585_p8, %p3584_p7 }
0x30e3   :  { %p3587_p10 = pnand %p3586_p9, %p3580_p6 }
0x3149   :  { %v2634_v20 = vpop.xlane.xlu1 %2633 }
0x314a   :  { %3443 = vlog2.f32 %v2634_v20  ;;  %v2632_v40 = vpop.xlane.xlu0 %2631 }
0x314b   :  { %3445 = vlog2.f32 %v2632_v40 }
0x314e   :  { %v1641_v41 = vpop.permute.xlu0 %1640 }
0x314f   :  { %1643 = vst.msk [vmem:[#allocation15] sm:$0x3] %vm1637_vm6, %v1641_v41 }
0x3150   :  { %3590 = shalt.err (!%p3587_p10)
}
0x3151   :  { %s3591_s20 = scalar_lea.hbm %s4299_s21, 32 }
0x3152   :  { %p3592_p11 = scmp.ne.s32.totalorder %s4299_s21, %s3591_s20  ;;  %p3595_p12 = scmp.lt.u32.totalorder %s3591_s20, %s4299_s21 }
0x3154   :  { %p3597_p13 = pnand %p3595_p12, %p3592_p11 }
0x3156   :  { %3600 = shalt.err (!%p3597_p13)
}
0x3157   :  { %2674 = dma.vmem_to_hbm [thread:$0]  %s2672_s22, 32, %s4299_s21, [#allocation14]   ;;  %v3444_v42 = vpop.eup %3443 }
0x3158   :  { %v3446_v26 = vpop.eup %3445  ;;  %v2638_v43 = vmul.f32 0.6931472, %v3444_v42  ;;  %s3649_s27 = smov [#allocation12]  }
0x3159   :  { %s2648_s17 = sshll.u32 %s3649_s27, 4  ;;  %v2636_v44 = vmul.f32 0.6931472, %v3446_v26  ;;  %s2649_s17 = int_to_ptr.vmem [resolvable:$true] %s2648_s17 }
0x315a   :  { %v2640_v45 = vsub.f32 %v2626_v27, %v2638_v43  ;;  %s3601_s18 = scalar_lea.vmem %s2649_s17, 256  ;;  %p3606_p1 = scmp.lt.s32.totalorder %s2649_s17, %s2649_s17 }
0x315b   :  { %v2639_v46 = vsub.f32 %v2625_v31, %v2636_v44  ;;  %p3602_p0 = scmp.ne.s32.totalorder %s2649_s17, %s3601_s18  ;;  %p3607_p2 = scmp.lt.s32.totalorder %s3601_s18, %s3601_s18 }
0x315c   :  { %2642 = vst [vmem:[#allocation12 + $0x8] sm:$0xff] %v2640_v45 }
0x315d   :  { %2641 = vst [vmem:[#allocation12] sm:$0xff] %v2639_v46  ;;  %p3608_p3 = por %p3607_p2, %p3606_p1 }
0x315f   :  { %p3609_p4 = pnand %p3608_p3, %p3602_p0 }
0x3161   :  { %3612 = shalt.err (!%p3609_p4)
}
0x3162   :  { %s3613_s28 = scalar_lea.hbm %s4297_s19, 256 }
0x3163   :  { %p3614_p5 = scmp.ne.s32.totalorder %s4297_s19, %s3613_s28  ;;  %p3617_p6 = scmp.lt.u32.totalorder %s3613_s28, %s4297_s19 }
0x3165   :  { %p3619_p7 = pnand %p3617_p6, %p3614_p5 }
0x3167   :  { %3622 = shalt.err (!%p3619_p7)
}
0x3168   :  { %2654 = dma.vmem_to_hbm [thread:$0]  %s2649_s17, 256, %s4297_s19, [#allocation5], %s3635_s8, %s3635_s8, %s3636_s2  }
0x3169   :  { %3629 = dma.done.wait [#allocation5], 256  }
0x316a   :  { %3630 = vsyncadd [#allocation5], 4294967040 }
0x316b   :  { %3631 = dma.done.wait [#allocation14], 64  }
0x316c   :  { %3632 = vsyncadd [#allocation14], 4294967232 }
0x316d   :  { %2684 = vsyncpa [#allocation4], 1 }
0x316e   :  { %2685 = vsyncpa [#allocation7], 1 }
0x316f   :  { %2686 = vsyncpa [#allocation10], 1 }
0x3170   :  { %2687 = vsyncpa [#allocation5], 1 }
0x3171   :  { %2688 = vsyncpa [#allocation14], 1 }

</bundles_post_ra>
